<compile_context>
chip_gen: v6e
topology: v6e:2x2x1
jax: 0.10.0
libtpu: 0.0.40
codegen_flags: <defaults>
</compile_context>

<pallas_src>
import functools

import jax
import jax.numpy as jnp
from jax import lax
from jax.experimental import pallas as pl
from jax.experimental.pallas import tpu as pltpu


def _round_up(x, m):
    return (x + m - 1) // m * m


# ----------------------------------------------------------------------------
# Tiled linear:  y = x @ w + b   (bf16 MXU operands, f32 accumulation)
# ----------------------------------------------------------------------------

def _matmul_kernel(x_ref, w_ref, b_ref, o_ref, acc_ref):
    @pl.when(pl.program_id(2) == 0)
    def _():
        acc_ref[...] = jnp.zeros_like(acc_ref)

    acc_ref[...] += jnp.dot(x_ref[...], w_ref[...],
                            preferred_element_type=jnp.float32)

    @pl.when(pl.program_id(2) == pl.num_programs(2) - 1)
    def _():
        o_ref[...] = (acc_ref[...] + b_ref[...]).astype(o_ref.dtype)


def pallas_linear(x, w, b):
    """y = x @ w + b   with x:[M,K], w:[K,N], b:[N]. Returns f32 [M,N]."""
    M, K = x.shape
    N = w.shape[1]
    tm = min(256, _round_up(M, 8))
    tn = min(512, _round_up(N, 128))
    tk = min(512, _round_up(K, 128))
    Mp, Np, Kp = _round_up(M, tm), _round_up(N, tn), _round_up(K, tk)
    xp = jnp.pad(x.astype(jnp.float32), ((0, Mp - M), (0, Kp - K))).astype(jnp.bfloat16)
    wp = jnp.pad(w.astype(jnp.float32), ((0, Kp - K), (0, Np - N))).astype(jnp.bfloat16)
    bp = jnp.pad(b.astype(jnp.float32).reshape(1, N), ((0, 0), (0, Np - N)))
    out = pl.pallas_call(
        _matmul_kernel,
        out_shape=jax.ShapeDtypeStruct((Mp, Np), jnp.float32),
        grid_spec=pltpu.PrefetchScalarGridSpec(
            num_scalar_prefetch=0,
            grid=(Mp // tm, Np // tn, Kp // tk),
            in_specs=[
                pl.BlockSpec((tm, tk), lambda i, j, k: (i, k)),
                pl.BlockSpec((tk, tn), lambda i, j, k: (k, j)),
                pl.BlockSpec((1, tn), lambda i, j, k: (0, j)),
            ],
            out_specs=pl.BlockSpec((tm, tn), lambda i, j, k: (i, j)),
            scratch_shapes=[pltpu.VMEM((tm, tn), jnp.float32)],
        ),
        compiler_params=pltpu.CompilerParams(
            dimension_semantics=("parallel", "parallel", "arbitrary")),
    )(xp, wp, bp)
    return out[:M, :N]


# ----------------------------------------------------------------------------
# Joint network:  clsProj(tanh(x[:,:,None,:] + y[:,None,:,:]))
# Tiled over (B, T, U); vocab padded to a multiple of 128 (lane-dense output).
# ----------------------------------------------------------------------------

def _joint_kernel(x_ref, y_ref, w_ref, b_ref, o_ref):
    x = x_ref[0].astype(jnp.float32)                 # (tt, C)
    y = y_ref[0].astype(jnp.float32)                 # (tu, C)
    z = jnp.tanh(x[:, None, :] + y[None, :, :])      # (tt, tu, C) f32
    tt, tu, C = z.shape
    # tu % 8 == 0 and C % 128 == 0 -> this flatten does not cross (8,128) tiles.
    zf = z.reshape(tt * tu, C).astype(jnp.bfloat16)
    out = jnp.dot(zf, w_ref[...], preferred_element_type=jnp.float32) + b_ref[...]
    o_ref[...] = out.reshape(1, tt, tu, -1).astype(o_ref.dtype)


def pallas_joint(xp, yp, w_cls, b_cls, tt=64, tu=64):
    B, T, C = xp.shape
    U = yp.shape[1]
    V = w_cls.shape[1]
    Cp = _round_up(C, 128)
    Vp = _round_up(V, 128)
    tt = min(tt, _round_up(T, 8))
    tu = min(tu, _round_up(U, 8))
    Tp = _round_up(T, tt)
    Up = _round_up(U, tu)
    xpad = jnp.pad(xp, ((0, 0), (0, Tp - T), (0, Cp - C))).astype(jnp.bfloat16)
    ypad = jnp.pad(yp, ((0, 0), (0, Up - U), (0, Cp - C))).astype(jnp.bfloat16)
    wpad = jnp.pad(w_cls.astype(jnp.float32), ((0, Cp - C), (0, Vp - V))).astype(jnp.bfloat16)
    bpad = jnp.pad(b_cls.astype(jnp.float32).reshape(1, V), ((0, 0), (0, Vp - V)))
    out = pl.pallas_call(
        _joint_kernel,
        out_shape=jax.ShapeDtypeStruct((B, Tp, Up, Vp), jnp.float32),
        grid_spec=pltpu.PrefetchScalarGridSpec(
            num_scalar_prefetch=0,
            grid=(B, Tp // tt, Up // tu),
            in_specs=[
                pl.BlockSpec((1, tt, Cp), lambda b, i, j: (b, i, 0)),
                pl.BlockSpec((1, tu, Cp), lambda b, i, j: (b, j, 0)),
                pl.BlockSpec((Cp, Vp), lambda b, i, j: (0, 0)),
                pl.BlockSpec((1, Vp), lambda b, i, j: (0, 0)),
            ],
            out_specs=pl.BlockSpec((1, tt, tu, Vp), lambda b, i, j: (b, i, j, 0)),
        ),
        compiler_params=pltpu.CompilerParams(
            dimension_semantics=("parallel", "parallel", "parallel")),
    )(xpad, ypad, wpad, bpad)
    return out[:, :T, :U, :V]


# ----------------------------------------------------------------------------
# LSTM: input projection via the tiled Pallas matmul, recurrence in a Pallas
# kernel with VMEM-resident W_hh and h/c state (grid over T, "arbitrary").
# Each gate's hidden dim is padded to 128 lanes so gate slices are vreg-aligned.
# ----------------------------------------------------------------------------

def _lstm_step_kernel(xg_ref, whh_ref, o_ref, h_ref, c_ref):
    @pl.when(pl.program_id(0) == 0)
    def _():
        h_ref[...] = jnp.zeros_like(h_ref)
        c_ref[...] = jnp.zeros_like(c_ref)

    Hp = h_ref.shape[-1]
    h = h_ref[...]
    c = c_ref[...]
    gates = xg_ref[0] + jnp.dot(h.astype(jnp.bfloat16), whh_ref[...],
                                preferred_element_type=jnp.float32)
    i = jax.nn.sigmoid(gates[:, 0 * Hp:1 * Hp])
    f = jax.nn.sigmoid(gates[:, 1 * Hp:2 * Hp])
    g = jnp.tanh(gates[:, 2 * Hp:3 * Hp])
    o = jax.nn.sigmoid(gates[:, 3 * Hp:4 * Hp])
    c_new = f * c + i * g
    h_new = o * jnp.tanh(c_new)
    h_ref[...] = h_new
    c_ref[...] = c_new
    o_ref[0] = h_new.astype(o_ref.dtype)


def pallas_lstm_scan(xg, whh_t):
    """xg: (T, Bp, 4*Hp) f32 precomputed input gates; whh_t: (Hp, 4*Hp) bf16."""
    T, Bp, G = xg.shape
    Hp = G // 4
    return pl.pallas_call(
        _lstm_step_kernel,
        out_shape=jax.ShapeDtypeStruct((T, Bp, Hp), jnp.float32),
        grid_spec=pltpu.PrefetchScalarGridSpec(
            num_scalar_prefetch=0,
            grid=(T,),
            in_specs=[
                pl.BlockSpec((1, Bp, G), lambda t: (t, 0, 0)),
                pl.BlockSpec((Hp, G), lambda t: (0, 0)),
            ],
            out_specs=pl.BlockSpec((1, Bp, Hp), lambda t: (t, 0, 0)),
            scratch_shapes=[pltpu.VMEM((Bp, Hp), jnp.float32),
                            pltpu.VMEM((Bp, Hp), jnp.float32)],
        ),
        compiler_params=pltpu.CompilerParams(
            dimension_semantics=("arbitrary",)),   # sequential recurrence
    )(xg, whh_t)


def lstm_layer(x, p, reverse=False):
    """Single-direction LSTM. x:[B,T,D] -> h:[B,T,H]. PyTorch gate order i,f,g,o."""
    B, T, D = x.shape
    H = p["W_hh"].shape[1]
    Hp = _round_up(H, 128)
    Bp = _round_up(B, 8)

    def pad_gates(w):  # (4H, X) -> (4Hp, X), each gate zero-padded to Hp rows
        w4 = w.reshape(4, H, -1)
        w4 = jnp.pad(w4, ((0, 0), (0, Hp - H), (0, 0)))
        return w4.reshape(4 * Hp, -1)

    W_ih_p = pad_gates(p["W_ih"])                                          # (4Hp, D)
    bias_p = pad_gates((p["b_ih"] + p["b_hh"]).reshape(-1, 1)).reshape(4 * Hp)
    W_hh_p = pad_gates(p["W_hh"])                                          # (4Hp, H)
    W_hh_T_p = jnp.pad(W_hh_p.T, ((0, Hp - H), (0, 0)))                    # (Hp, 4Hp)

    # Input projection for all timesteps at once (tiled bf16 Pallas matmul).
    xg = pallas_linear(x.reshape(B * T, D), W_ih_p.T, bias_p).reshape(B, T, 4 * Hp)
    if reverse:
        xg = xg[:, ::-1, :]
    xg = jnp.pad(jnp.swapaxes(xg, 0, 1), ((0, 0), (0, Bp - B), (0, 0)))    # (T, Bp, 4Hp)

    hs = pallas_lstm_scan(xg, W_hh_T_p.astype(jnp.bfloat16))               # (T, Bp, Hp)
    hs = jnp.swapaxes(hs[:, :B, :H], 0, 1)                                 # (B, T, H)
    if reverse:
        hs = hs[:, ::-1, :]
    return hs


# ----------------------------------------------------------------------------
# Parameter construction (deterministic)
# ----------------------------------------------------------------------------

def _init_lstm_dir(key, d_in, h):
    k1, k2, k3, k4 = jax.random.split(key, 4)
    s = 0.1
    return {
        "W_ih": s * jax.random.normal(k1, (4 * h, d_in), jnp.float32),
        "W_hh": s * jax.random.normal(k2, (4 * h, h), jnp.float32),
        "b_ih": s * jax.random.normal(k3, (4 * h,), jnp.float32),
        "b_hh": s * jax.random.normal(k4, (4 * h,), jnp.float32),
    }


def _init_linear(key, d_in, d_out):
    k1, k2 = jax.random.split(key)
    s = 0.1
    return {
        "w": s * jax.random.normal(k1, (d_in, d_out), jnp.float32),
        "b": s * jax.random.normal(k2, (d_out,), jnp.float32),
    }


def init_params(key, args):
    keys = jax.random.split(key, 16)
    params = {}
    # tNet: n_layer bidirectional LSTM, per-direction hidden = hid_tr // 2
    h_dir = args["hid_tr"] // 2
    tnet = []
    d_in = args["in_dim"]
    for l in range(args["n_layer"]):
        kf, kb = jax.random.split(keys[l], 2)
        tnet.append({
            "fwd": _init_lstm_dir(kf, d_in, h_dir),
            "bwd": _init_lstm_dir(kb, d_in, h_dir),
        })
        d_in = 2 * h_dir
    params["tnet"] = tnet
    # pNet: 1 layer unidirectional, input dim 10 (embedding size) -> hid_pr
    params["pnet"] = [{"fwd": _init_lstm_dir(keys[8], 10, args["hid_pr"])}]
    params["prEmb"] = 0.1 * jax.random.normal(keys[9], (args["vocab_size"], 10), jnp.float32)
    params["bottle"] = _init_linear(keys[10], args["hid_tr"], 768)
    params["projTr"] = _init_linear(keys[11], 768, 256)
    params["projPr"] = _init_linear(keys[12], args["hid_pr"], 256)
    params["clsProj"] = _init_linear(keys[13], 256, args["vocab_size"])
    return params


# ----------------------------------------------------------------------------
# RNNT forward
# ----------------------------------------------------------------------------

@functools.partial(jax.jit, static_argnames=())
def rnnt_forward(params, speech, tokens):
    B, T, _ = speech.shape
    U = tokens.shape[1]

    # forward_tr: stacked bidirectional LSTM
    x = speech.astype(jnp.float32)
    for layer in params["tnet"]:
        fwd = lstm_layer(x, layer["fwd"], reverse=False)
        bwd = lstm_layer(x, layer["bwd"], reverse=True)
        x = jnp.concatenate([fwd, bwd], axis=-1)

    # bottle + projTr fused algebraically (no nonlinearity between; dropout is
    # identity in eval mode): one hid_tr -> 256 matmul instead of two, skipping
    # the (B*T, 768) intermediate entirely.
    w_fused = params["bottle"]["w"] @ params["projTr"]["w"]
    b_fused = params["bottle"]["b"] @ params["projTr"]["w"] + params["projTr"]["b"]
    xp = pallas_linear(x.reshape(B * T, x.shape[-1]), w_fused, b_fused).reshape(B, T, 256)

    # forward_pr: embedding -> unidirectional LSTM -> projPr
    y = params["prEmb"][tokens]  # [B, U, 10]
    for layer in params["pnet"]:
        y = lstm_layer(y, layer["fwd"], reverse=False)
    yp = pallas_linear(
        y.reshape(B * U, y.shape[-1]), params["projPr"]["w"], params["projPr"]["b"]
    ).reshape(B, U, 256)

    # forward_jnt: broadcast add, tanh, clsProj (tiled over B/T/U)
    pred = pallas_joint(xp, yp, params["clsProj"]["w"], params["clsProj"]["b"])
    return pred  # [B, T, U, vocab_size]


# ----------------------------------------------------------------------------
# Main
# ----------------------------------------------------------------------------

if __name__ == "__main__":
    args = {
        "n_layer": 2,
        "in_dim": 16,
        "hid_tr": 32,
        "hid_pr": 32,
        "vocab_size": 16,
        "dropout": 0.1,
        "unidirectional": False,
        "deep_spec": False,
        "enc_type": "lstm",
    }

    key = jax.random.PRNGKey(0)
    k_param, k_speech, k_tok = jax.random.split(key, 3)

    B, T, U = 2, 8, 6
    speech = jax.random.normal(k_speech, (B, T, args["in_dim"]), jnp.float32)
    tokens = jax.random.randint(k_tok, (B, U), 0, args["vocab_size"], jnp.int32)

    params = init_params(k_param, args)

    pred = rnnt_forward(params, speech, tokens)
    pred = jax.block_until_ready(pred)

    assert pred.shape == (B, T, U, args["vocab_size"]), pred.shape
    assert pred.dtype == jnp.float32
    assert bool(jnp.all(jnp.isfinite(pred)))
    print("KERNEL_OK")
</pallas_src>

<mosaic_0001>
module attributes {stable_mosaic.version = 11 : i64} {
  func.func @_matmul_kernel(%arg0: i32, %arg1: i32, %arg2: i32, %arg3: memref<16x128xbf16, #tpu.memory_space<vmem>>, %arg4: memref<128x512xbf16, #tpu.memory_space<vmem>>, %arg5: memref<1x512xf32, #tpu.memory_space<vmem>>, %arg6: memref<16x512xf32, #tpu.memory_space<vmem>>, %arg7: memref<16x512xf32, #tpu.memory_space<vmem>>) attributes {dimension_semantics = [#tpu.dimension_semantics<parallel>, #tpu.dimension_semantics<parallel>, #tpu.dimension_semantics<arbitrary>], iteration_bounds = array<i64: 1, 1, 1>, scalar_prefetch = 0 : i64, scratch_operands = 1 : i64, tpu.core_type = #tpu.core_type<tc>, window_params = [{transform_indices = @transform_0, window_bounds = array<i64: 16, 128>}, {transform_indices = @transform_1, window_bounds = array<i64: 128, 512>}, {transform_indices = @transform_2, window_bounds = array<i64: 1, 512>}, {transform_indices = @transform_3, window_bounds = array<i64: 16, 512>}]} {
    %c0_i32 = arith.constant 0 : i32
    %0 = arith.cmpi eq, %arg2, %c0_i32 : i32
    %1 = arith.extui %0 : i1 to i32
    %c0_i32_0 = arith.constant 0 : i32
    %2 = arith.cmpi ne, %1, %c0_i32_0 : i32
    scf.if %2 {
      %cst_10 = arith.constant 0.000000e+00 : f32
      %12 = vector.broadcast %cst_10 : f32 to vector<16x512xf32>
      %c0_11 = arith.constant 0 : index
      %c0_12 = arith.constant 0 : index
      %13 = vector.load %arg7[%c0_11, %c0_12] : memref<16x512xf32, #tpu.memory_space<vmem>>, vector<16x512xf32>
      tpu.vector_store %arg7[%c0_11, %c0_12], %12 {strides = array<i32>} : memref<16x512xf32, #tpu.memory_space<vmem>>, vector<16x512xf32>,
    } else {
    }
    %c0 = arith.constant 0 : index
    %c0_1 = arith.constant 0 : index
    %3 = vector.load %arg7[%c0, %c0_1] : memref<16x512xf32, #tpu.memory_space<vmem>>, vector<16x512xf32>
    %c0_2 = arith.constant 0 : index
    %c0_3 = arith.constant 0 : index
    %4 = vector.load %arg3[%c0_2, %c0_3] : memref<16x128xbf16, #tpu.memory_space<vmem>>, vector<16x128xbf16>
    %c0_4 = arith.constant 0 : index
    %c0_5 = arith.constant 0 : index
    %5 = vector.load %arg4[%c0_4, %c0_5] : memref<128x512xbf16, #tpu.memory_space<vmem>>, vector<128x512xbf16>
    %cst = arith.constant dense<0.000000e+00> : vector<16x512xf32>
    %6 = tpu.matmul %4, %5, %cst {dimension_numbers = #tpu.dot_dimension_numbers<[1], [0], [0], [1], [0, 0, 1, 1], [], []>} : vector<16x128xbf16>, vector<128x512xbf16>, vector<16x512xf32> -> vector<16x512xf32>
    %7 = arith.addf %3, %6 : vector<16x512xf32>
    %c0_6 = arith.constant 0 : index
    %c0_7 = arith.constant 0 : index
    %8 = vector.load %arg7[%c0_6, %c0_7] : memref<16x512xf32, #tpu.memory_space<vmem>>, vector<16x512xf32>
    tpu.vector_store %arg7[%c0_6, %c0_7], %7 {strides = array<i32>} : memref<16x512xf32, #tpu.memory_space<vmem>>, vector<16x512xf32>,
    %c0_i32_8 = arith.constant 0 : i32
    %9 = arith.cmpi eq, %arg2, %c0_i32_8 : i32
    %10 = arith.extui %9 : i1 to i32
    %c0_i32_9 = arith.constant 0 : i32
    %11 = arith.cmpi ne, %10, %c0_i32_9 : i32
    scf.if %11 {
      %c0_10 = arith.constant 0 : index
      %c0_11 = arith.constant 0 : index
      %12 = vector.load %arg7[%c0_10, %c0_11] : memref<16x512xf32, #tpu.memory_space<vmem>>, vector<16x512xf32>
      %c0_12 = arith.constant 0 : index
      %c0_13 = arith.constant 0 : index
      %13 = vector.load %arg5[%c0_12, %c0_13] : memref<1x512xf32, #tpu.memory_space<vmem>>, vector<1x512xf32>
      %14 = vector.broadcast %13 : vector<1x512xf32> to vector<16x512xf32>
      %15 = arith.addf %12, %14 : vector<16x512xf32>
      %c0_14 = arith.constant 0 : index
      %c0_15 = arith.constant 0 : index
      %16 = vector.load %arg6[%c0_14, %c0_15] : memref<16x512xf32, #tpu.memory_space<vmem>>, vector<16x512xf32>
      tpu.vector_store %arg6[%c0_14, %c0_15], %15 {strides = array<i32>} : memref<16x512xf32, #tpu.memory_space<vmem>>, vector<16x512xf32>,
    } else {
    }
    return
  }
  func.func @transform_0(%arg0: i32, %arg1: i32, %arg2: i32) -> (i32, i32) {
    %c0_i32 = arith.constant 0 : i32
    return %arg0, %arg2 : i32, i32
  }
  func.func @transform_1(%arg0: i32, %arg1: i32, %arg2: i32) -> (i32, i32) {
    %c0_i32 = arith.constant 0 : i32
    return %arg2, %arg1 : i32, i32
  }
  func.func @transform_2(%arg0: i32, %arg1: i32, %arg2: i32) -> (i32, i32) {
    %c0_i32 = arith.constant 0 : i32
    %c0_i32_0 = arith.constant 0 : i32
    return %c0_i32, %arg1 : i32, i32
  }
  func.func @transform_3(%arg0: i32, %arg1: i32, %arg2: i32) -> (i32, i32) {
    %c0_i32 = arith.constant 0 : i32
    return %arg0, %arg1 : i32, i32
  }
}

module attributes {stable_mosaic.version = 11 : i64} {
  func.func @_lstm_step_kernel(%arg0: i32, %arg1: memref<1x8x512xf32, #tpu.memory_space<vmem>>, %arg2: memref<128x512xbf16, #tpu.memory_space<vmem>>, %arg3: memref<1x8x128xf32, #tpu.memory_space<vmem>>, %arg4: memref<8x128xf32, #tpu.memory_space<vmem>>, %arg5: memref<8x128xf32, #tpu.memory_space<vmem>>) attributes {dimension_semantics = [#tpu.dimension_semantics<arbitrary>], iteration_bounds = array<i64: 8>, scalar_prefetch = 0 : i64, scratch_operands = 2 : i64, tpu.core_type = #tpu.core_type<tc>, window_params = [{transform_indices = @transform_0, window_bounds = array<i64: 1, 8, 512>}, {pipeline_mode = #tpu.pipeline_mode<synchronous>, transform_indices = @transform_1, window_bounds = array<i64: 128, 512>}, {transform_indices = @transform_2, window_bounds = array<i64: 1, 8, 128>}]} {
    %c0_i32 = arith.constant 0 : i32
    %0 = arith.cmpi eq, %arg0, %c0_i32 : i32
    %1 = arith.extui %0 : i1 to i32
    %c0_i32_0 = arith.constant 0 : i32
    %2 = arith.cmpi ne, %1, %c0_i32_0 : i32
    scf.if %2 {
      %cst_19 = arith.constant 0.000000e+00 : f32
      %41 = vector.broadcast %cst_19 : f32 to vector<8x128xf32>
      %c0_20 = arith.constant 0 : index
      %c0_21 = arith.constant 0 : index
      %42 = vector.load %arg4[%c0_20, %c0_21] : memref<8x128xf32, #tpu.memory_space<vmem>>, vector<8x128xf32>
      tpu.vector_store %arg4[%c0_20, %c0_21], %41 {strides = array<i32>} : memref<8x128xf32, #tpu.memory_space<vmem>>, vector<8x128xf32>,
      %cst_22 = arith.constant 0.000000e+00 : f32
      %43 = vector.broadcast %cst_22 : f32 to vector<8x128xf32>
      %c0_23 = arith.constant 0 : index
      %c0_24 = arith.constant 0 : index
      %44 = vector.load %arg5[%c0_23, %c0_24] : memref<8x128xf32, #tpu.memory_space<vmem>>, vector<8x128xf32>
      tpu.vector_store %arg5[%c0_23, %c0_24], %43 {strides = array<i32>} : memref<8x128xf32, #tpu.memory_space<vmem>>, vector<8x128xf32>,
    } else {
    }
    %c0 = arith.constant 0 : index
    %c0_1 = arith.constant 0 : index
    %3 = vector.load %arg4[%c0, %c0_1] : memref<8x128xf32, #tpu.memory_space<vmem>>, vector<8x128xf32>
    %c0_2 = arith.constant 0 : index
    %c0_3 = arith.constant 0 : index
    %4 = vector.load %arg5[%c0_2, %c0_3] : memref<8x128xf32, #tpu.memory_space<vmem>>, vector<8x128xf32>
    %c0_4 = arith.constant 0 : index
    %c0_5 = arith.constant 0 : index
    %c0_6 = arith.constant 0 : index
    %5 = vector.load %arg1[%c0_4, %c0_5, %c0_6] : memref<1x8x512xf32, #tpu.memory_space<vmem>>, vector<1x8x512xf32>
    %6 = vector.shape_cast %5 : vector<1x8x512xf32> to vector<8x512xf32>
    %7 = arith.truncf %3 : vector<8x128xf32> to vector<8x128xbf16>
    %c0_7 = arith.constant 0 : index
    %c0_8 = arith.constant 0 : index
    %8 = vector.load %arg2[%c0_7, %c0_8] : memref<128x512xbf16, #tpu.memory_space<vmem>>, vector<128x512xbf16>
    %cst = arith.constant dense<0.000000e+00> : vector<8x512xf32>
    %9 = tpu.matmul %7, %8, %cst {dimension_numbers = #tpu.dot_dimension_numbers<[1], [0], [0], [1], [0, 0, 1, 1], [], []>} : vector<8x128xbf16>, vector<128x512xbf16>, vector<8x512xf32> -> vector<8x512xf32>
    %10 = arith.addf %6, %9 : vector<8x512xf32>
    %11 = vector.extract_strided_slice %10 {offsets = [0, 0], sizes = [8, 128], strides = [1, 1]} : vector<8x512xf32> to vector<8x128xf32>
    %12 = arith.negf %11 : vector<8x128xf32>
    %13 = math.exp %12 : vector<8x128xf32>
    %cst_9 = arith.constant 1.000000e+00 : f32
    %14 = vector.broadcast %cst_9 : f32 to vector<8x128xf32>
    %15 = arith.addf %14, %13 : vector<8x128xf32>
    %16 = arith.divf %14, %15 : vector<8x128xf32>
    %17 = vector.extract_strided_slice %10 {offsets = [0, 128], sizes = [8, 128], strides = [1, 1]} : vector<8x512xf32> to vector<8x128xf32>
    %18 = arith.negf %17 : vector<8x128xf32>
    %19 = math.exp %18 : vector<8x128xf32>
    %cst_10 = arith.constant 1.000000e+00 : f32
    %20 = vector.broadcast %cst_10 : f32 to vector<8x128xf32>
    %21 = arith.addf %20, %19 : vector<8x128xf32>
    %22 = arith.divf %20, %21 : vector<8x128xf32>
    %23 = vector.extract_strided_slice %10 {offsets = [0, 256], sizes = [8, 128], strides = [1, 1]} : vector<8x512xf32> to vector<8x128xf32>
    %24 = math.tanh %23 : vector<8x128xf32>
    %25 = vector.extract_strided_slice %10 {offsets = [0, 384], sizes = [8, 128], strides = [1, 1]} : vector<8x512xf32> to vector<8x128xf32>
    %26 = arith.negf %25 : vector<8x128xf32>
    %27 = math.exp %26 : vector<8x128xf32>
    %cst_11 = arith.constant 1.000000e+00 : f32
    %28 = vector.broadcast %cst_11 : f32 to vector<8x128xf32>
    %29 = arith.addf %28, %27 : vector<8x128xf32>
    %30 = arith.divf %28, %29 : vector<8x128xf32>
    %31 = arith.mulf %22, %4 : vector<8x128xf32>
    %32 = arith.mulf %16, %24 : vector<8x128xf32>
    %33 = arith.addf %31, %32 : vector<8x128xf32>
    %34 = math.tanh %33 : vector<8x128xf32>
    %35 = arith.mulf %30, %34 : vector<8x128xf32>
    %c0_12 = arith.constant 0 : index
    %c0_13 = arith.constant 0 : index
    %36 = vector.load %arg4[%c0_12, %c0_13] : memref<8x128xf32, #tpu.memory_space<vmem>>, vector<8x128xf32>
    tpu.vector_store %arg4[%c0_12, %c0_13], %35 {strides = array<i32>} : memref<8x128xf32, #tpu.memory_space<vmem>>, vector<8x128xf32>,
    %c0_14 = arith.constant 0 : index
    %c0_15 = arith.constant 0 : index
    %37 = vector.load %arg5[%c0_14, %c0_15] : memref<8x128xf32, #tpu.memory_space<vmem>>, vector<8x128xf32>
    tpu.vector_store %arg5[%c0_14, %c0_15], %33 {strides = array<i32>} : memref<8x128xf32, #tpu.memory_space<vmem>>, vector<8x128xf32>,
    %c0_16 = arith.constant 0 : index
    %c0_17 = arith.constant 0 : index
    %c0_18 = arith.constant 0 : index
    %38 = vector.load %arg3[%c0_16, %c0_17, %c0_18] : memref<1x8x128xf32, #tpu.memory_space<vmem>>, vector<1x8x128xf32>
    %39 = vector.shape_cast %38 : vector<1x8x128xf32> to vector<8x128xf32>
    %40 = vector.shape_cast %35 : vector<8x128xf32> to vector<1x8x128xf32>
    tpu.vector_store %arg3[%c0_16, %c0_17, %c0_18], %40 {strides = array<i32>} : memref<1x8x128xf32, #tpu.memory_space<vmem>>, vector<1x8x128xf32>,
    return
  }
  func.func @transform_0(%arg0: i32) -> (i32, i32, i32) {
    %c0_i32 = arith.constant 0 : i32
    %c0_i32_0 = arith.constant 0 : i32
    %c0_i32_1 = arith.constant 0 : i32
    return %arg0, %c0_i32, %c0_i32_0 : i32, i32, i32
  }
  func.func @transform_1(%arg0: i32) -> (i32, i32) {
    %c0_i32 = arith.constant 0 : i32
    %c0_i32_0 = arith.constant 0 : i32
    %c0_i32_1 = arith.constant 0 : i32
    return %c0_i32, %c0_i32_0 : i32, i32
  }
  func.func @transform_2(%arg0: i32) -> (i32, i32, i32) {
    %c0_i32 = arith.constant 0 : i32
    %c0_i32_0 = arith.constant 0 : i32
    %c0_i32_1 = arith.constant 0 : i32
    return %arg0, %c0_i32, %c0_i32_0 : i32, i32, i32
  }
}

module attributes {stable_mosaic.version = 11 : i64} {
  func.func @_matmul_kernel(%arg0: i32, %arg1: i32, %arg2: i32, %arg3: memref<16x128xbf16, #tpu.memory_space<vmem>>, %arg4: memref<128x256xbf16, #tpu.memory_space<vmem>>, %arg5: memref<1x256xf32, #tpu.memory_space<vmem>>, %arg6: memref<16x256xf32, #tpu.memory_space<vmem>>, %arg7: memref<16x256xf32, #tpu.memory_space<vmem>>) attributes {dimension_semantics = [#tpu.dimension_semantics<parallel>, #tpu.dimension_semantics<parallel>, #tpu.dimension_semantics<arbitrary>], iteration_bounds = array<i64: 1, 1, 1>, scalar_prefetch = 0 : i64, scratch_operands = 1 : i64, tpu.core_type = #tpu.core_type<tc>, window_params = [{transform_indices = @transform_0, window_bounds = array<i64: 16, 128>}, {transform_indices = @transform_1, window_bounds = array<i64: 128, 256>}, {transform_indices = @transform_2, window_bounds = array<i64: 1, 256>}, {transform_indices = @transform_3, window_bounds = array<i64: 16, 256>}]} {
    %c0_i32 = arith.constant 0 : i32
    %0 = arith.cmpi eq, %arg2, %c0_i32 : i32
    %1 = arith.extui %0 : i1 to i32
    %c0_i32_0 = arith.constant 0 : i32
    %2 = arith.cmpi ne, %1, %c0_i32_0 : i32
    scf.if %2 {
      %cst_10 = arith.constant 0.000000e+00 : f32
      %12 = vector.broadcast %cst_10 : f32 to vector<16x256xf32>
      %c0_11 = arith.constant 0 : index
      %c0_12 = arith.constant 0 : index
      %13 = vector.load %arg7[%c0_11, %c0_12] : memref<16x256xf32, #tpu.memory_space<vmem>>, vector<16x256xf32>
      tpu.vector_store %arg7[%c0_11, %c0_12], %12 {strides = array<i32>} : memref<16x256xf32, #tpu.memory_space<vmem>>, vector<16x256xf32>,
    } else {
    }
    %c0 = arith.constant 0 : index
    %c0_1 = arith.constant 0 : index
    %3 = vector.load %arg7[%c0, %c0_1] : memref<16x256xf32, #tpu.memory_space<vmem>>, vector<16x256xf32>
    %c0_2 = arith.constant 0 : index
    %c0_3 = arith.constant 0 : index
    %4 = vector.load %arg3[%c0_2, %c0_3] : memref<16x128xbf16, #tpu.memory_space<vmem>>, vector<16x128xbf16>
    %c0_4 = arith.constant 0 : index
    %c0_5 = arith.constant 0 : index
    %5 = vector.load %arg4[%c0_4, %c0_5] : memref<128x256xbf16, #tpu.memory_space<vmem>>, vector<128x256xbf16>
    %cst = arith.constant dense<0.000000e+00> : vector<16x256xf32>
    %6 = tpu.matmul %4, %5, %cst {dimension_numbers = #tpu.dot_dimension_numbers<[1], [0], [0], [1], [0, 0, 1, 1], [], []>} : vector<16x128xbf16>, vector<128x256xbf16>, vector<16x256xf32> -> vector<16x256xf32>
    %7 = arith.addf %3, %6 : vector<16x256xf32>
    %c0_6 = arith.constant 0 : index
    %c0_7 = arith.constant 0 : index
    %8 = vector.load %arg7[%c0_6, %c0_7] : memref<16x256xf32, #tpu.memory_space<vmem>>, vector<16x256xf32>
    tpu.vector_store %arg7[%c0_6, %c0_7], %7 {strides = array<i32>} : memref<16x256xf32, #tpu.memory_space<vmem>>, vector<16x256xf32>,
    %c0_i32_8 = arith.constant 0 : i32
    %9 = arith.cmpi eq, %arg2, %c0_i32_8 : i32
    %10 = arith.extui %9 : i1 to i32
    %c0_i32_9 = arith.constant 0 : i32
    %11 = arith.cmpi ne, %10, %c0_i32_9 : i32
    scf.if %11 {
      %c0_10 = arith.constant 0 : index
      %c0_11 = arith.constant 0 : index
      %12 = vector.load %arg7[%c0_10, %c0_11] : memref<16x256xf32, #tpu.memory_space<vmem>>, vector<16x256xf32>
      %c0_12 = arith.constant 0 : index
      %c0_13 = arith.constant 0 : index
      %13 = vector.load %arg5[%c0_12, %c0_13] : memref<1x256xf32, #tpu.memory_space<vmem>>, vector<1x256xf32>
      %14 = vector.broadcast %13 : vector<1x256xf32> to vector<16x256xf32>
      %15 = arith.addf %12, %14 : vector<16x256xf32>
      %c0_14 = arith.constant 0 : index
      %c0_15 = arith.constant 0 : index
      %16 = vector.load %arg6[%c0_14, %c0_15] : memref<16x256xf32, #tpu.memory_space<vmem>>, vector<16x256xf32>
      tpu.vector_store %arg6[%c0_14, %c0_15], %15 {strides = array<i32>} : memref<16x256xf32, #tpu.memory_space<vmem>>, vector<16x256xf32>,
    } else {
    }
    return
  }
  func.func @transform_0(%arg0: i32, %arg1: i32, %arg2: i32) -> (i32, i32) {
    %c0_i32 = arith.constant 0 : i32
    return %arg0, %arg2 : i32, i32
  }
  func.func @transform_1(%arg0: i32, %arg1: i32, %arg2: i32) -> (i32, i32) {
    %c0_i32 = arith.constant 0 : i32
    return %arg2, %arg1 : i32, i32
  }
  func.func @transform_2(%arg0: i32, %arg1: i32, %arg2: i32) -> (i32, i32) {
    %c0_i32 = arith.constant 0 : i32
    %c0_i32_0 = arith.constant 0 : i32
    return %c0_i32, %arg1 : i32, i32
  }
  func.func @transform_3(%arg0: i32, %arg1: i32, %arg2: i32) -> (i32, i32) {
    %c0_i32 = arith.constant 0 : i32
    return %arg0, %arg1 : i32, i32
  }
}

module attributes {stable_mosaic.version = 11 : i64} {
  func.func @_lstm_step_kernel(%arg0: i32, %arg1: memref<1x8x512xf32, #tpu.memory_space<vmem>>, %arg2: memref<128x512xbf16, #tpu.memory_space<vmem>>, %arg3: memref<1x8x128xf32, #tpu.memory_space<vmem>>, %arg4: memref<8x128xf32, #tpu.memory_space<vmem>>, %arg5: memref<8x128xf32, #tpu.memory_space<vmem>>) attributes {dimension_semantics = [#tpu.dimension_semantics<arbitrary>], iteration_bounds = array<i64: 6>, scalar_prefetch = 0 : i64, scratch_operands = 2 : i64, tpu.core_type = #tpu.core_type<tc>, window_params = [{transform_indices = @transform_0, window_bounds = array<i64: 1, 8, 512>}, {pipeline_mode = #tpu.pipeline_mode<synchronous>, transform_indices = @transform_1, window_bounds = array<i64: 128, 512>}, {transform_indices = @transform_2, window_bounds = array<i64: 1, 8, 128>}]} {
    %c0_i32 = arith.constant 0 : i32
    %0 = arith.cmpi eq, %arg0, %c0_i32 : i32
    %1 = arith.extui %0 : i1 to i32
    %c0_i32_0 = arith.constant 0 : i32
    %2 = arith.cmpi ne, %1, %c0_i32_0 : i32
    scf.if %2 {
      %cst_19 = arith.constant 0.000000e+00 : f32
      %41 = vector.broadcast %cst_19 : f32 to vector<8x128xf32>
      %c0_20 = arith.constant 0 : index
      %c0_21 = arith.constant 0 : index
      %42 = vector.load %arg4[%c0_20, %c0_21] : memref<8x128xf32, #tpu.memory_space<vmem>>, vector<8x128xf32>
      tpu.vector_store %arg4[%c0_20, %c0_21], %41 {strides = array<i32>} : memref<8x128xf32, #tpu.memory_space<vmem>>, vector<8x128xf32>,
      %cst_22 = arith.constant 0.000000e+00 : f32
      %43 = vector.broadcast %cst_22 : f32 to vector<8x128xf32>
      %c0_23 = arith.constant 0 : index
      %c0_24 = arith.constant 0 : index
      %44 = vector.load %arg5[%c0_23, %c0_24] : memref<8x128xf32, #tpu.memory_space<vmem>>, vector<8x128xf32>
      tpu.vector_store %arg5[%c0_23, %c0_24], %43 {strides = array<i32>} : memref<8x128xf32, #tpu.memory_space<vmem>>, vector<8x128xf32>,
    } else {
    }
    %c0 = arith.constant 0 : index
    %c0_1 = arith.constant 0 : index
    %3 = vector.load %arg4[%c0, %c0_1] : memref<8x128xf32, #tpu.memory_space<vmem>>, vector<8x128xf32>
    %c0_2 = arith.constant 0 : index
    %c0_3 = arith.constant 0 : index
    %4 = vector.load %arg5[%c0_2, %c0_3] : memref<8x128xf32, #tpu.memory_space<vmem>>, vector<8x128xf32>
    %c0_4 = arith.constant 0 : index
    %c0_5 = arith.constant 0 : index
    %c0_6 = arith.constant 0 : index
    %5 = vector.load %arg1[%c0_4, %c0_5, %c0_6] : memref<1x8x512xf32, #tpu.memory_space<vmem>>, vector<1x8x512xf32>
    %6 = vector.shape_cast %5 : vector<1x8x512xf32> to vector<8x512xf32>
    %7 = arith.truncf %3 : vector<8x128xf32> to vector<8x128xbf16>
    %c0_7 = arith.constant 0 : index
    %c0_8 = arith.constant 0 : index
    %8 = vector.load %arg2[%c0_7, %c0_8] : memref<128x512xbf16, #tpu.memory_space<vmem>>, vector<128x512xbf16>
    %cst = arith.constant dense<0.000000e+00> : vector<8x512xf32>
    %9 = tpu.matmul %7, %8, %cst {dimension_numbers = #tpu.dot_dimension_numbers<[1], [0], [0], [1], [0, 0, 1, 1], [], []>} : vector<8x128xbf16>, vector<128x512xbf16>, vector<8x512xf32> -> vector<8x512xf32>
    %10 = arith.addf %6, %9 : vector<8x512xf32>
    %11 = vector.extract_strided_slice %10 {offsets = [0, 0], sizes = [8, 128], strides = [1, 1]} : vector<8x512xf32> to vector<8x128xf32>
    %12 = arith.negf %11 : vector<8x128xf32>
    %13 = math.exp %12 : vector<8x128xf32>
    %cst_9 = arith.constant 1.000000e+00 : f32
    %14 = vector.broadcast %cst_9 : f32 to vector<8x128xf32>
    %15 = arith.addf %14, %13 : vector<8x128xf32>
    %16 = arith.divf %14, %15 : vector<8x128xf32>
    %17 = vector.extract_strided_slice %10 {offsets = [0, 128], sizes = [8, 128], strides = [1, 1]} : vector<8x512xf32> to vector<8x128xf32>
    %18 = arith.negf %17 : vector<8x128xf32>
    %19 = math.exp %18 : vector<8x128xf32>
    %cst_10 = arith.constant 1.000000e+00 : f32
    %20 = vector.broadcast %cst_10 : f32 to vector<8x128xf32>
    %21 = arith.addf %20, %19 : vector<8x128xf32>
    %22 = arith.divf %20, %21 : vector<8x128xf32>
    %23 = vector.extract_strided_slice %10 {offsets = [0, 256], sizes = [8, 128], strides = [1, 1]} : vector<8x512xf32> to vector<8x128xf32>
    %24 = math.tanh %23 : vector<8x128xf32>
    %25 = vector.extract_strided_slice %10 {offsets = [0, 384], sizes = [8, 128], strides = [1, 1]} : vector<8x512xf32> to vector<8x128xf32>
    %26 = arith.negf %25 : vector<8x128xf32>
    %27 = math.exp %26 : vector<8x128xf32>
    %cst_11 = arith.constant 1.000000e+00 : f32
    %28 = vector.broadcast %cst_11 : f32 to vector<8x128xf32>
    %29 = arith.addf %28, %27 : vector<8x128xf32>
    %30 = arith.divf %28, %29 : vector<8x128xf32>
    %31 = arith.mulf %22, %4 : vector<8x128xf32>
    %32 = arith.mulf %16, %24 : vector<8x128xf32>
    %33 = arith.addf %31, %32 : vector<8x128xf32>
    %34 = math.tanh %33 : vector<8x128xf32>
    %35 = arith.mulf %30, %34 : vector<8x128xf32>
    %c0_12 = arith.constant 0 : index
    %c0_13 = arith.constant 0 : index
    %36 = vector.load %arg4[%c0_12, %c0_13] : memref<8x128xf32, #tpu.memory_space<vmem>>, vector<8x128xf32>
    tpu.vector_store %arg4[%c0_12, %c0_13], %35 {strides = array<i32>} : memref<8x128xf32, #tpu.memory_space<vmem>>, vector<8x128xf32>,
    %c0_14 = arith.constant 0 : index
    %c0_15 = arith.constant 0 : index
    %37 = vector.load %arg5[%c0_14, %c0_15] : memref<8x128xf32, #tpu.memory_space<vmem>>, vector<8x128xf32>
    tpu.vector_store %arg5[%c0_14, %c0_15], %33 {strides = array<i32>} : memref<8x128xf32, #tpu.memory_space<vmem>>, vector<8x128xf32>,
    %c0_16 = arith.constant 0 : index
    %c0_17 = arith.constant 0 : index
    %c0_18 = arith.constant 0 : index
    %38 = vector.load %arg3[%c0_16, %c0_17, %c0_18] : memref<1x8x128xf32, #tpu.memory_space<vmem>>, vector<1x8x128xf32>
    %39 = vector.shape_cast %38 : vector<1x8x128xf32> to vector<8x128xf32>
    %40 = vector.shape_cast %35 : vector<8x128xf32> to vector<1x8x128xf32>
    tpu.vector_store %arg3[%c0_16, %c0_17, %c0_18], %40 {strides = array<i32>} : memref<1x8x128xf32, #tpu.memory_space<vmem>>, vector<1x8x128xf32>,
    return
  }
  func.func @transform_0(%arg0: i32) -> (i32, i32, i32) {
    %c0_i32 = arith.constant 0 : i32
    %c0_i32_0 = arith.constant 0 : i32
    %c0_i32_1 = arith.constant 0 : i32
    return %arg0, %c0_i32, %c0_i32_0 : i32, i32, i32
  }
  func.func @transform_1(%arg0: i32) -> (i32, i32) {
    %c0_i32 = arith.constant 0 : i32
    %c0_i32_0 = arith.constant 0 : i32
    %c0_i32_1 = arith.constant 0 : i32
    return %c0_i32, %c0_i32_0 : i32, i32
  }
  func.func @transform_2(%arg0: i32) -> (i32, i32, i32) {
    %c0_i32 = arith.constant 0 : i32
    %c0_i32_0 = arith.constant 0 : i32
    %c0_i32_1 = arith.constant 0 : i32
    return %arg0, %c0_i32, %c0_i32_0 : i32, i32, i32
  }
}

module attributes {stable_mosaic.version = 11 : i64} {
  func.func @_joint_kernel(%arg0: i32, %arg1: i32, %arg2: i32, %arg3: memref<1x8x256xbf16, #tpu.memory_space<vmem>>, %arg4: memref<1x8x256xbf16, #tpu.memory_space<vmem>>, %arg5: memref<256x128xbf16, #tpu.memory_space<vmem>>, %arg6: memref<1x128xf32, #tpu.memory_space<vmem>>, %arg7: memref<1x8x8x128xf32, #tpu.memory_space<vmem>>) attributes {dimension_semantics = [#tpu.dimension_semantics<parallel>, #tpu.dimension_semantics<parallel>, #tpu.dimension_semantics<parallel>], iteration_bounds = array<i64: 2, 1, 1>, scalar_prefetch = 0 : i64, scratch_operands = 0 : i64, tpu.core_type = #tpu.core_type<tc>, window_params = [{transform_indices = @transform_0, window_bounds = array<i64: 1, 8, 256>}, {transform_indices = @transform_1, window_bounds = array<i64: 1, 8, 256>}, {pipeline_mode = #tpu.pipeline_mode<synchronous>, transform_indices = @transform_2, window_bounds = array<i64: 256, 128>}, {pipeline_mode = #tpu.pipeline_mode<synchronous>, transform_indices = @transform_3, window_bounds = array<i64: 1, 128>}, {transform_indices = @transform_4, window_bounds = array<i64: 1, 8, 8, 128>}]} {
    %c0 = arith.constant 0 : index
    %c0_0 = arith.constant 0 : index
    %c0_1 = arith.constant 0 : index
    %0 = vector.load %arg3[%c0, %c0_0, %c0_1] : memref<1x8x256xbf16, #tpu.memory_space<vmem>>, vector<1x8x256xbf16>
    %1 = vector.shape_cast %0 : vector<1x8x256xbf16> to vector<8x256xbf16>
    %2 = arith.extf %1 : vector<8x256xbf16> to vector<8x256xf32>
    %c0_2 = arith.constant 0 : index
    %c0_3 = arith.constant 0 : index
    %c0_4 = arith.constant 0 : index
    %3 = vector.load %arg4[%c0_2, %c0_3, %c0_4] : memref<1x8x256xbf16, #tpu.memory_space<vmem>>, vector<1x8x256xbf16>
    %4 = vector.shape_cast %3 : vector<1x8x256xbf16> to vector<8x256xbf16>
    %5 = arith.extf %4 : vector<8x256xbf16> to vector<8x256xf32>
    %6 = vector.shape_cast %2 : vector<8x256xf32> to vector<8x1x256xf32>
    %7 = vector.shape_cast %5 : vector<8x256xf32> to vector<1x8x256xf32>
    %8 = vector.broadcast %6 : vector<8x1x256xf32> to vector<8x8x256xf32>
    %9 = vector.broadcast %7 : vector<1x8x256xf32> to vector<8x8x256xf32>
    %10 = arith.addf %8, %9 : vector<8x8x256xf32>
    %11 = math.tanh %10 : vector<8x8x256xf32>
    %12 = vector.shape_cast %11 : vector<8x8x256xf32> to vector<64x256xf32>
    %13 = arith.truncf %12 : vector<64x256xf32> to vector<64x256xbf16>
    %c0_5 = arith.constant 0 : index
    %c0_6 = arith.constant 0 : index
    %14 = vector.load %arg5[%c0_5, %c0_6] : memref<256x128xbf16, #tpu.memory_space<vmem>>, vector<256x128xbf16>
    %cst = arith.constant dense<0.000000e+00> : vector<64x128xf32>
    %15 = tpu.matmul %13, %14, %cst {dimension_numbers = #tpu.dot_dimension_numbers<[1], [0], [0], [1], [0, 0, 1, 1], [], []>} : vector<64x256xbf16>, vector<256x128xbf16>, vector<64x128xf32> -> vector<64x128xf32>
    %c0_7 = arith.constant 0 : index
    %c0_8 = arith.constant 0 : index
    %16 = vector.load %arg6[%c0_7, %c0_8] : memref<1x128xf32, #tpu.memory_space<vmem>>, vector<1x128xf32>
    %17 = vector.broadcast %16 : vector<1x128xf32> to vector<64x128xf32>
    %18 = arith.addf %15, %17 : vector<64x128xf32>
    %19 = vector.shape_cast %18 : vector<64x128xf32> to vector<1x8x8x128xf32>
    %c0_9 = arith.constant 0 : index
    %c0_10 = arith.constant 0 : index
    %c0_11 = arith.constant 0 : index
    %c0_12 = arith.constant 0 : index
    %20 = vector.load %arg7[%c0_9, %c0_10, %c0_11, %c0_12] : memref<1x8x8x128xf32, #tpu.memory_space<vmem>>, vector<1x8x8x128xf32>
    tpu.vector_store %arg7[%c0_9, %c0_10, %c0_11, %c0_12], %19 {strides = array<i32>} : memref<1x8x8x128xf32, #tpu.memory_space<vmem>>, vector<1x8x8x128xf32>,
    return
  }
  func.func @transform_0(%arg0: i32, %arg1: i32, %arg2: i32) -> (i32, i32, i32) {
    %c0_i32 = arith.constant 0 : i32
    %c0_i32_0 = arith.constant 0 : i32
    return %arg0, %arg1, %c0_i32 : i32, i32, i32
  }
  func.func @transform_1(%arg0: i32, %arg1: i32, %arg2: i32) -> (i32, i32, i32) {
    %c0_i32 = arith.constant 0 : i32
    %c0_i32_0 = arith.constant 0 : i32
    return %arg0, %arg2, %c0_i32 : i32, i32, i32
  }
  func.func @transform_2(%arg0: i32, %arg1: i32, %arg2: i32) -> (i32, i32) {
    %c0_i32 = arith.constant 0 : i32
    %c0_i32_0 = arith.constant 0 : i32
    %c0_i32_1 = arith.constant 0 : i32
    return %c0_i32, %c0_i32_0 : i32, i32
  }
  func.func @transform_3(%arg0: i32, %arg1: i32, %arg2: i32) -> (i32, i32) {
    %c0_i32 = arith.constant 0 : i32
    %c0_i32_0 = arith.constant 0 : i32
    %c0_i32_1 = arith.constant 0 : i32
    return %c0_i32, %c0_i32_0 : i32, i32
  }
  func.func @transform_4(%arg0: i32, %arg1: i32, %arg2: i32) -> (i32, i32, i32, i32) {
    %c0_i32 = arith.constant 0 : i32
    %c0_i32_0 = arith.constant 0 : i32
    return %arg0, %arg1, %arg2, %c0_i32 : i32, i32, i32, i32
  }
}

</mosaic_0001>

<bundles_post_ra>
// kernel: rnnt_forward.16
= control target key start
LH: loop header
LB: loop body
LE: loop exit
PB: predicated region body
PF: predicated region fallthrough
CT: control target
= control target key end

     0   :  { %s660_s9 = smov 0   ;;  %s782_s0 = inlined_call_operand.vmem [shape: f32[8,8,512], index: 0, kind: input, shape index: {}]   ;;  %s783_s1 = inlined_call_operand.vmem [shape: bf16[128,512], index: 1, kind: input, shape index: {}]   ;;  %s784_s2 = inlined_call_operand.vmem [shape: f32[8,8,128], index: 2, kind: output, shape index: {}]  }
   0x1 LB: > { %s514_s10 = sadd.s32 4294967295, %s641_s9   ;;  %p518_p0 = scmp.ge.s32.totalorder %s641_s9, 1  ;;  %s641_s9 = sphi %s660_s9, %s12_s9  }
   0x2   : > { %p112_p1 = scmp.lt.s32.totalorder %s641_s9, 9 }
   0x4   : > { %p113_p2 = pnand %p518_p0, %p112_p1 }
   0x5   : > { %p133_p3 = scmp.lt.s32.totalorder (!%p113_p2), %s514_s10, 7  ;;  %p522_p4 = scmp.ne.s32.totalorder (!%p113_p2), %s514_s10, 0 }
   0x6   : > { %116 = sbr.rel (%p113_p2) target bundleno = 303 (0x12f), region = 28 }
   0xb   : > { %s134_s11 = scalar_select %p133_p3, %s514_s10, 7 }
   0xc   : > { %146 = sbr.rel (%p522_p4) target bundleno = 19 (0x13), region = 32 }
   0xd   : > { %s560_s12 = sshll.u32 %s134_s11, 5  ;;  %s521_s13 = sshll.u32 %s134_s11, 3 }
   0xe   : > { %s671_s16 = scalar_lea.vmem %s782_s0, %s560_s12  ;;  %s676_s19 = scalar_lea.vmem %s784_s2, %s521_s13 }
  0x11   : > { %v643_v0 = vmov 0.0  }
  0x12   : > { %147 = vst [vmem:[#allocation2] sm:$0xff] %v643_v0  ;;  %148 = vst [vmem:[#allocation3] sm:$0xff] %v643_v0 }
  0x13 PF: > { %v571_v1 = vld [vmem:[%s783_s1 + $0xe4] ss:$16 sps:$4 sm:$0xff]   ;;  %v573_v2 = vld [vmem:[%s783_s1 + $0xe0] ss:$16 sps:$4 sm:$0xff]   ;;  %v644_v3 = vmov 0   ;;  %v152_v38 = vld [vmem:[%s671_s16 + $0x8] sm:$0xff] }
  0x14   : > { %380 = vmatprep.mubr.bf16.mxu0 %v644_v3  ;;  %421 = vmatprep.mubr.bf16.mxu1 %v644_v3  ;;  %v574_v4 = vld [vmem:[%s783_s1 + $0xc4] ss:$16 sps:$4 sm:$0xff]   ;;  %v576_v5 = vld [vmem:[%s783_s1 + $0xc0] ss:$16 sps:$4 sm:$0xff]   ;;  %v582_v7 = vld [vmem:[%s783_s1 + $0xec] ss:$16 sps:$4 sm:$0xff]  }
  0x15   : > { %348 = vmatprep.subr.bf16.mxu0 %v571_v1  ;;  %v577_v6 = vld [vmem:[%s783_s1 + $0xa4] ss:$16 sps:$4 sm:$0xff]   ;;  %v585_v8 = vld [vmem:[%s783_s1 + $0xe8] ss:$16 sps:$4 sm:$0xff]   ;;  %v579_v9 = vld [vmem:[%s783_s1 + $0xa0] ss:$16 sps:$4 sm:$0xff]   ;;  %389 = vmatprep.subr.bf16.mxu1 %v582_v7 }
  0x16   : > { %349 = vmatpush1.bf16.msra.mxu0 %v573_v2  ;;  %v580_v10 = vld [vmem:[%s783_s1 + $0x84] ss:$16 sps:$4 sm:$0xff]   ;;  %390 = vmatpush1.bf16.msra.mxu1 %v585_v8  ;;  %v588_v11 = vld [vmem:[%s783_s1 + $0xcc] ss:$16 sps:$4 sm:$0xff]   ;;  %v591_v12 = vld [vmem:[%s783_s1 + $0xc8] ss:$16 sps:$4 sm:$0xff]  }
  0x17   : > { %350 = vmatprep.subr.bf16.mxu0 %v574_v4  ;;  %391 = vmatprep.subr.bf16.mxu1 %v588_v11  ;;  %v584_v13 = vld [vmem:[%s783_s1 + $0x80] ss:$16 sps:$4 sm:$0xff]   ;;  %v586_v14 = vld [vmem:[%s783_s1 + $0x64] ss:$16 sps:$4 sm:$0xff]   ;;  %v594_v15 = vld [vmem:[%s783_s1 + $0xac] ss:$16 sps:$4 sm:$0xff]  }
  0x18   : > { %v597_v16 = vld [vmem:[%s783_s1 + $0xa8] ss:$16 sps:$4 sm:$0xff]   ;;  %v600_v17 = vld [vmem:[%s783_s1 + $0x8c] ss:$16 sps:$4 sm:$0xff]   ;;  %v590_v18 = vld [vmem:[%s783_s1 + $0x60] ss:$16 sps:$4 sm:$0xff]  }
  0x19   : > { %v592_v19 = vld [vmem:[%s783_s1 + $0x44] ss:$16 sps:$4 sm:$0xff]   ;;  %v603_v20 = vld [vmem:[%s783_s1 + $0x88] ss:$16 sps:$4 sm:$0xff]   ;;  %v606_v21 = vld [vmem:[%s783_s1 + $0x6c] ss:$16 sps:$4 sm:$0xff]  }
  0x1a   : > { %351 = vmatpush1.bf16.msra.mxu0 %v576_v5  ;;  %392 = vmatpush1.bf16.msra.mxu1 %v591_v12  ;;  %v596_v22 = vld [vmem:[%s783_s1 + $0x40] ss:$16 sps:$4 sm:$0xff]   ;;  %v598_v23 = vld [vmem:[%s783_s1 + $0x24] ss:$16 sps:$4 sm:$0xff]   ;;  %v609_v24 = vld [vmem:[%s783_s1 + $0x68] ss:$16 sps:$4 sm:$0xff]  }
  0x1b   : > { %352 = vmatprep.subr.bf16.mxu0 %v577_v6  ;;  %393 = vmatprep.subr.bf16.mxu1 %v594_v15  ;;  %v610_v25 = vld [vmem:[%s783_s1 + $0x4c] ss:$16 sps:$4 sm:$0xff]   ;;  %v602_v26 = vld [vmem:[%s783_s1 + $0x20] ss:$16 sps:$4 sm:$0xff]   ;;  %v604_v27 = vld [vmem:[%s783_s1 + $0x4] ss:$16 sps:$4 sm:$0xff]  }
  0x1c   : > { %v612_v28 = vld [vmem:[%s783_s1 + $0x48] ss:$16 sps:$4 sm:$0xff]   ;;  %v613_v29 = vld [vmem:[%s783_s1 + $0x2c] ss:$16 sps:$4 sm:$0xff]   ;;  %v608_v30 = vld [vmem:[%s783_s1] ss:$16 sps:$4 sm:$0xff]  }
  0x1d   : > { %v149_v31 = vld [vmem:[#allocation2] sm:$0xff]  ;;  %v615_v32 = vld [vmem:[%s783_s1 + $0x28] ss:$16 sps:$4 sm:$0xff]   ;;  %v616_v33 = vld [vmem:[%s783_s1 + $0xc] ss:$16 sps:$4 sm:$0xff]  }
  0x1e   : > { %353 = vmatpush1.bf16.msra.mxu0 %v579_v9  ;;  %394 = vmatpush1.bf16.msra.mxu1 %v597_v16  ;;  %v155_v34 = vpack.c.bf16 %v149_v31, %v149_v31  ;;  %v618_v35 = vld [vmem:[%s783_s1 + $0x8] ss:$16 sps:$4 sm:$0xff]   ;;  %v151_v36 = vld [vmem:[%s671_s16] sm:$0xff]  ;;  %v153_v51 = vld [vmem:[%s671_s16 + $0x10] sm:$0xff] }
  0x1f   : > { %354 = vmatprep.subr.bf16.mxu0 %v580_v10  ;;  %395 = vmatprep.subr.bf16.mxu1 %v600_v17  ;;  %v154_v48 = vld [vmem:[%s671_s16 + $0x18] sm:$0xff]  ;;  %v150_v62 = vld [vmem:[#allocation3] sm:$0xff] }
  0x22   : > { %355 = vmatpush1.bf16.msra.mxu0 %v584_v13  ;;  %396 = vmatpush1.bf16.msra.mxu1 %v603_v20 }
  0x23   : > { %356 = vmatprep.subr.bf16.mxu0 %v586_v14  ;;  %397 = vmatprep.subr.bf16.mxu1 %v606_v21 }
  0x26   : > { %357 = vmatpush1.bf16.msra.mxu0 %v590_v18  ;;  %398 = vmatpush1.bf16.msra.mxu1 %v609_v24 }
  0x27   : > { %358 = vmatprep.subr.bf16.mxu0 %v592_v19  ;;  %399 = vmatprep.subr.bf16.mxu1 %v610_v25 }
  0x2a   : > { %359 = vmatpush1.bf16.msra.mxu0 %v596_v22  ;;  %400 = vmatpush1.bf16.msra.mxu1 %v612_v28 }
  0x2b   : > { %360 = vmatprep.subr.bf16.mxu0 %v598_v23  ;;  %401 = vmatprep.subr.bf16.mxu1 %v613_v29 }
  0x2e   : > { %361 = vmatpush1.bf16.msra.mxu0 %v602_v26  ;;  %402 = vmatpush1.bf16.msra.mxu1 %v615_v32 }
  0x2f   : > { %362 = vmatprep.subr.bf16.mxu0 %v604_v27  ;;  %403 = vmatprep.subr.bf16.mxu1 %v616_v33 }
  0x32   : > { %363 = vmatpush1.bf16.msra.mxu0 %v608_v30  ;;  %404 = vmatpush1.bf16.msra.mxu1 %v618_v35 }
  0x35   : > { %381 = vmatmul.mubr.bf16.vlgmr.msra.gmra.mxu0 %v155_v34  ;;  %422 = vmatmul.mubr.bf16.vlgmr.msra.gmra.mxu1 %v155_v34 }
  0xf5   : > { %v382_v37 = vpop.f32.mrf.mxu0  ;;  %v423_v45 = vpop.f32.mrf.mxu1 }
  0xf6   : > { %v430_v39 = vadd.f32 %v382_v37, %v151_v36  ;;  %v432_v53 = vadd.f32 %v423_v45, %v153_v51 }
  0xf7   : > { %v384_v40 = vpop.f32.mrf.mxu0  ;;  %v425_v47 = vpop.f32.mrf.mxu1 }
  0xf8   : > { %v555_v41 = vmul.f32 -1.442695, %v430_v39  ;;  %v431_v42 = vadd.f32 %v384_v40, %v152_v38  ;;  %v433_v52 = vadd.f32 %v425_v47, %v154_v48 }
  0xf9   : > { %v386_v43 = vpop.f32.mrf.mxu0  ;;  %v427_v49 = vpop.f32.mrf.mxu1 }
  0xfa   : > { %619 = vpow2.f32 %v555_v41  ;;  %v556_v44 = vmul.f32 -1.442695, %v431_v42  ;;  %v557_v54 = vmul.f32 -1.442695, %v433_v52 }
  0xfb   : > { %v387_v46 = vpop.f32.mrf.mxu0  ;;  %v428_v50 = vpop.f32.mrf.mxu1 }
  0xfc   : > { %621 = vpow2.f32 %v556_v44 }
  0xfd   : > { %623 = vtanh.f32 %v432_v53 }
  0xfe   : > { %625 = vpow2.f32 %v557_v54 }
 0x107   : > { %v620_v55 = vpop.eup %619 }
 0x108   : > { %v437_v56 = vadd.f32 1.0, %v620_v55 }
 0x109   : > { %v622_v57 = vpop.eup %621 }
 0x10a   : > { %627 = vrcp.f32 %v437_v56  ;;  %v443_v58 = vadd.f32 1.0, %v622_v57  ;;  %v624_v59 = vpop.eup %623 }
 0x10b   : > { %v626_v60 = vpop.eup %625 }
 0x10c   : > { %629 = vrcp.f32 %v443_v58  ;;  %v450_v0 = vadd.f32 1.0, %v626_v60 }
 0x10e   : > { %631 = vrcp.f32 %v450_v0 }
 0x117   : > { %v628_v61 = vpop.eup %627 }
 0x118   : > { %v454_v2 = vmul.f32 %v628_v61, %v624_v59 }
 0x119   : > { %v630_v63 = vpop.eup %629 }
 0x11a   : > { %v453_v1 = vmul.f32 %v630_v63, %v150_v62 }
 0x11b   : > { %v632_v4 = vpop.eup %631 }
 0x11c   : > { %v455_v3 = vadd.f32 %v454_v2, %v453_v1 }
 0x11e   : > { %633 = vtanh.f32 %v455_v3  ;;  %459 = vst [vmem:[#allocation3] sm:$0xff] %v455_v3 }
 0x12b   : > { %v634_v5 = vpop.eup %633 }
 0x12c   : > { %v457_v6 = vmul.f32 %v634_v5, %v632_v4 }
 0x12e   : > { %458 = vst [vmem:[#allocation2] sm:$0xff] %v457_v6  ;;  %460 = vst [vmem:[%s676_s19] sm:$0xff] %v457_v6 }
 0x12f PF: > { %s12_s9 = sadd.s32 1, %s641_s9  }
 0x130   : > { %p9_p5 = scmp.ge.s32.totalorder %s12_s9, 10  }
 0x132   :  { %11 = sbr.rel (!%p9_p5) target bundleno = 1 (0x1), region = 62 }

// kernel: rnnt_forward.15
= control target key start
LH: loop header
LB: loop body
LE: loop exit
PB: predicated region body
PF: predicated region fallthrough
CT: control target
= control target key end

     0   :  { %v473_v1 = vmov 0   ;;  %v350_v34 = vlaneseq  ;;  %s620_s1 = inlined_call_operand.vmem [shape: bf16[128,512], index: 1, kind: input, shape index: {}]   ;;  %s621_s0 = inlined_call_operand.vmem [shape: bf16[16,128], index: 0, kind: input, shape index: {}]   ;;  %s622_s2 = inlined_call_operand.vmem [shape: f32[1,512], index: 2, kind: input, shape index: {}]   ;;  %s623_s3 = inlined_call_operand.vmem [shape: f32[16,512], index: 3, kind: output, shape index: {}]  }
   0x1   :  { %v424_v0 = vld [vmem:[%s620_s1 + $0xe4] ss:$16 sps:$4 sm:$0xff]   ;;  %267 = vmatprep.mubr.bf16.mxu0 %v473_v1  ;;  %310 = vmatprep.mubr.bf16.mxu1 %v473_v1  ;;  %v426_v2 = vld [vmem:[%s620_s1 + $0xec] ss:$16 sps:$4 sm:$0xff]   ;;  %v428_v3 = vld [vmem:[%s620_s1 + $0xe0] ss:$16 sps:$4 sm:$0xff]  }
   0x2   :  { %235 = vmatprep.subr.bf16.mxu0 %v424_v0  ;;  %v429_v4 = vld [vmem:[%s620_s1 + $0xe8] ss:$16 sps:$4 sm:$0xff]   ;;  %278 = vmatprep.subr.bf16.mxu1 %v426_v2  ;;  %v430_v5 = vld [vmem:[%s620_s1 + $0xc4] ss:$16 sps:$4 sm:$0xff]   ;;  %v432_v6 = vld [vmem:[%s620_s1 + $0xcc] ss:$16 sps:$4 sm:$0xff]  }
   0x3   :  { %236 = vmatpush1.bf16.msra.mxu0 %v428_v3  ;;  %279 = vmatpush1.bf16.msra.mxu1 %v429_v4  ;;  %v434_v7 = vld [vmem:[%s620_s1 + $0xc0] ss:$16 sps:$4 sm:$0xff]   ;;  %v435_v8 = vld [vmem:[%s620_s1 + $0xc8] ss:$16 sps:$4 sm:$0xff]   ;;  %v436_v9 = vld [vmem:[%s620_s1 + $0xa4] ss:$16 sps:$4 sm:$0xff]  }
   0x4   :  { %237 = vmatprep.subr.bf16.mxu0 %v430_v5  ;;  %280 = vmatprep.subr.bf16.mxu1 %v432_v6  ;;  %v438_v10 = vld [vmem:[%s620_s1 + $0xac] ss:$16 sps:$4 sm:$0xff]   ;;  %v440_v11 = vld [vmem:[%s620_s1 + $0xa0] ss:$16 sps:$4 sm:$0xff]   ;;  %v441_v12 = vld [vmem:[%s620_s1 + $0xa8] ss:$16 sps:$4 sm:$0xff]  }
   0x5   :  { %v442_v13 = vld [vmem:[%s620_s1 + $0x84] ss:$16 sps:$4 sm:$0xff]   ;;  %v444_v14 = vld [vmem:[%s620_s1 + $0x8c] ss:$16 sps:$4 sm:$0xff]   ;;  %v446_v15 = vld [vmem:[%s620_s1 + $0x80] ss:$16 sps:$4 sm:$0xff]  }
   0x6   :  { %v447_v16 = vld [vmem:[%s620_s1 + $0x88] ss:$16 sps:$4 sm:$0xff]   ;;  %v448_v17 = vld [vmem:[%s620_s1 + $0x64] ss:$16 sps:$4 sm:$0xff]   ;;  %v450_v18 = vld [vmem:[%s620_s1 + $0x6c] ss:$16 sps:$4 sm:$0xff]  }
   0x7   :  { %238 = vmatpush1.bf16.msra.mxu0 %v434_v7  ;;  %281 = vmatpush1.bf16.msra.mxu1 %v435_v8  ;;  %v452_v19 = vld [vmem:[%s620_s1 + $0x60] ss:$16 sps:$4 sm:$0xff]   ;;  %v453_v20 = vld [vmem:[%s620_s1 + $0x68] ss:$16 sps:$4 sm:$0xff]   ;;  %v454_v21 = vld [vmem:[%s620_s1 + $0x44] ss:$16 sps:$4 sm:$0xff]  }
   0x8   :  { %239 = vmatprep.subr.bf16.mxu0 %v436_v9  ;;  %282 = vmatprep.subr.bf16.mxu1 %v438_v10  ;;  %v456_v22 = vld [vmem:[%s620_s1 + $0x4c] ss:$16 sps:$4 sm:$0xff]   ;;  %v458_v23 = vld [vmem:[%s620_s1 + $0x40] ss:$16 sps:$4 sm:$0xff]   ;;  %v459_v24 = vld [vmem:[%s620_s1 + $0x48] ss:$16 sps:$4 sm:$0xff]  }
   0x9   :  { %v460_v25 = vld [vmem:[%s620_s1 + $0x24] ss:$16 sps:$4 sm:$0xff]   ;;  %v462_v26 = vld [vmem:[%s620_s1 + $0x2c] ss:$16 sps:$4 sm:$0xff]   ;;  %v464_v27 = vld [vmem:[%s620_s1 + $0x20] ss:$16 sps:$4 sm:$0xff]  }
   0xa   :  { %v465_v28 = vld [vmem:[%s620_s1 + $0x28] ss:$16 sps:$4 sm:$0xff]   ;;  %v466_v29 = vld [vmem:[%s620_s1 + $0x4] ss:$16 sps:$4 sm:$0xff]   ;;  %v468_v30 = vld [vmem:[%s620_s1 + $0xc] ss:$16 sps:$4 sm:$0xff]  }
   0xb   :  { %240 = vmatpush1.bf16.msra.mxu0 %v440_v11  ;;  %283 = vmatpush1.bf16.msra.mxu1 %v441_v12  ;;  %v470_v31 = vld [vmem:[%s620_s1] ss:$16 sps:$4 sm:$0xff]   ;;  %v471_v32 = vld [vmem:[%s620_s1 + $0x8] ss:$16 sps:$4 sm:$0xff]   ;;  %v351_v35 = vshrl.u32 %v350_v34, 7 }
   0xc   :  { %241 = vmatprep.subr.bf16.mxu0 %v442_v13  ;;  %284 = vmatprep.subr.bf16.mxu1 %v444_v14  ;;  %v472_v33 = vld [vmem:[%s621_s0] sm:$0xff]  }
   0xd   :  { %v352_v36 = vsub.s32 0, %v351_v35  ;;  %v360_v37 = vsub.s32 2, %v351_v35  ;;  %v348_v38 = vld [vmem:[%s622_s2] sm:$0xf]  ;;  %v356_v39 = vsub.s32 1, %v351_v35  ;;  %v364_v40 = vsub.s32 3, %v351_v35 }
   0xf   :  { %242 = vmatpush1.bf16.msra.mxu0 %v446_v15  ;;  %285 = vmatpush1.bf16.msra.mxu1 %v447_v16  ;;  %v353_v41 = vrot.slane %v348_v38, %v352_v36  ;;  %v361_v42 = vrot.slane %v348_v38, %v360_v37  ;;  %v357_v43 = vrot.slane %v348_v38, %v356_v39 }
  0x10   :  { %243 = vmatprep.subr.bf16.mxu0 %v448_v17  ;;  %286 = vmatprep.subr.bf16.mxu1 %v450_v18  ;;  %v365_v44 = vrot.slane %v348_v38, %v364_v40 }
  0x13   :  { %244 = vmatpush1.bf16.msra.mxu0 %v452_v19  ;;  %287 = vmatpush1.bf16.msra.mxu1 %v453_v20 }
  0x14   :  { %245 = vmatprep.subr.bf16.mxu0 %v454_v21  ;;  %288 = vmatprep.subr.bf16.mxu1 %v456_v22 }
  0x17   :  { %246 = vmatpush1.bf16.msra.mxu0 %v458_v23  ;;  %289 = vmatpush1.bf16.msra.mxu1 %v459_v24 }
  0x18   :  { %247 = vmatprep.subr.bf16.mxu0 %v460_v25  ;;  %290 = vmatprep.subr.bf16.mxu1 %v462_v26 }
  0x1b   :  { %248 = vmatpush1.bf16.msra.mxu0 %v464_v27  ;;  %291 = vmatpush1.bf16.msra.mxu1 %v465_v28 }
  0x1c   :  { %249 = vmatprep.subr.bf16.mxu0 %v466_v29  ;;  %292 = vmatprep.subr.bf16.mxu1 %v468_v30 }
  0x1f   :  { %250 = vmatpush1.bf16.msra.mxu0 %v470_v31  ;;  %293 = vmatpush1.bf16.msra.mxu1 %v471_v32 }
  0x22   :  { %268 = vmatmul.mubr.bf16.vlgmr.msra.gmra.mxu0 %v472_v33  ;;  %311 = vmatmul.mubr.bf16.vlgmr.msra.gmra.mxu1 %v472_v33 }
  0xe2   :  { %v269_v45 = vpop.f32.mrf.mxu0  ;;  %v312_v46 = vpop.f32.mrf.mxu1 }
  0xe3   :  { %v370_v47 = vadd.f32 %v353_v41, %v269_v45  ;;  %v372_v48 = vadd.f32 %v361_v42, %v312_v46 }
  0xe4   :  { %v271_v49 = vpop.f32.mrf.mxu0  ;;  %v314_v50 = vpop.f32.mrf.mxu1 }
  0xe5   :  { %378 = vst [vmem:[%s623_s3] sm:$0xff] %v370_v47  ;;  %380 = vst [vmem:[%s623_s3 + $0x10] sm:$0xff] %v372_v48  ;;  %v371_v51 = vadd.f32 %v357_v43, %v271_v49  ;;  %v373_v52 = vadd.f32 %v365_v44, %v314_v50 }
  0xe6   :  { %v273_v53 = vpop.f32.mrf.mxu0  ;;  %v316_v54 = vpop.f32.mrf.mxu1 }
  0xe7   :  { %379 = vst [vmem:[%s623_s3 + $0x8] sm:$0xff] %v371_v51  ;;  %381 = vst [vmem:[%s623_s3 + $0x18] sm:$0xff] %v373_v52  ;;  %v374_v55 = vadd.f32 %v353_v41, %v273_v53  ;;  %v376_v56 = vadd.f32 %v361_v42, %v316_v54 }
  0xe8   :  { %v275_v57 = vpop.f32.mrf.mxu0  ;;  %v318_v58 = vpop.f32.mrf.mxu1 }
  0xe9   :  { %382 = vst [vmem:[%s623_s3 + $0x20] sm:$0xff] %v374_v55  ;;  %384 = vst [vmem:[%s623_s3 + $0x30] sm:$0xff] %v376_v56  ;;  %v375_v59 = vadd.f32 %v357_v43, %v275_v57  ;;  %v377_v60 = vadd.f32 %v365_v44, %v318_v58 }
  0xeb   :  { %383 = vst [vmem:[%s623_s3 + $0x28] sm:$0xff] %v375_v59  ;;  %385 = vst [vmem:[%s623_s3 + $0x38] sm:$0xff] %v377_v60 }

// kernel: rnnt_forward.21
= control target key start
LH: loop header
LB: loop body
LE: loop exit
PB: predicated region body
PF: predicated region fallthrough
CT: control target
= control target key end

     0   :  { %v256_v1 = vmov 0   ;;  %v191_v18 = vlaneseq  ;;  %s343_s1 = inlined_call_operand.vmem [shape: bf16[128,256], index: 1, kind: input, shape index: {}]   ;;  %s344_s0 = inlined_call_operand.vmem [shape: bf16[16,128], index: 0, kind: input, shape index: {}]   ;;  %s345_s2 = inlined_call_operand.vmem [shape: f32[1,256], index: 2, kind: input, shape index: {}]   ;;  %s346_s3 = inlined_call_operand.vmem [shape: f32[16,256], index: 3, kind: output, shape index: {}]  }
   0x1   :  { %v231_v0 = vld [vmem:[%s343_s1 + $0x74] ss:$8 sps:$4 sm:$0xff]   ;;  %163 = vmatprep.mubr.bf16.mxu0 %v256_v1  ;;  %v233_v2 = vld [vmem:[%s343_s1 + $0x70] ss:$8 sps:$4 sm:$0xff]   ;;  %v234_v3 = vld [vmem:[%s343_s1 + $0x64] ss:$8 sps:$4 sm:$0xff]  }
   0x2   :  { %131 = vmatprep.subr.bf16.mxu0 %v231_v0  ;;  %v236_v4 = vld [vmem:[%s343_s1 + $0x60] ss:$8 sps:$4 sm:$0xff]   ;;  %v237_v5 = vld [vmem:[%s343_s1 + $0x54] ss:$8 sps:$4 sm:$0xff]   ;;  %v239_v6 = vld [vmem:[%s343_s1 + $0x50] ss:$8 sps:$4 sm:$0xff]  }
   0x3   :  { %132 = vmatpush1.bf16.msra.mxu0 %v233_v2  ;;  %v240_v7 = vld [vmem:[%s343_s1 + $0x44] ss:$8 sps:$4 sm:$0xff]   ;;  %v242_v8 = vld [vmem:[%s343_s1 + $0x40] ss:$8 sps:$4 sm:$0xff]   ;;  %v243_v9 = vld [vmem:[%s343_s1 + $0x34] ss:$8 sps:$4 sm:$0xff]  }
   0x4   :  { %133 = vmatprep.subr.bf16.mxu0 %v234_v3  ;;  %v245_v10 = vld [vmem:[%s343_s1 + $0x30] ss:$8 sps:$4 sm:$0xff]   ;;  %v246_v11 = vld [vmem:[%s343_s1 + $0x24] ss:$8 sps:$4 sm:$0xff]   ;;  %v248_v12 = vld [vmem:[%s343_s1 + $0x20] ss:$8 sps:$4 sm:$0xff]  }
   0x5   :  { %v249_v13 = vld [vmem:[%s343_s1 + $0x14] ss:$8 sps:$4 sm:$0xff]   ;;  %v251_v14 = vld [vmem:[%s343_s1 + $0x10] ss:$8 sps:$4 sm:$0xff]   ;;  %v252_v15 = vld [vmem:[%s343_s1 + $0x4] ss:$8 sps:$4 sm:$0xff]  }
   0x6   :  { %v254_v16 = vld [vmem:[%s343_s1] ss:$8 sps:$4 sm:$0xff]   ;;  %v192_v19 = vshrl.u32 %v191_v18, 7 }
   0x7   :  { %134 = vmatpush1.bf16.msra.mxu0 %v236_v4  ;;  %v255_v17 = vld [vmem:[%s344_s0] sm:$0xff]  }
   0x8   :  { %135 = vmatprep.subr.bf16.mxu0 %v237_v5  ;;  %v193_v20 = vsub.s32 0, %v192_v19  ;;  %v189_v21 = vld [vmem:[%s345_s2] sm:$0x3]  ;;  %v197_v22 = vsub.s32 1, %v192_v19 }
   0xa   :  { %v194_v23 = vrot.slane %v189_v21, %v193_v20  ;;  %v198_v24 = vrot.slane %v189_v21, %v197_v22 }
   0xb   :  { %136 = vmatpush1.bf16.msra.mxu0 %v239_v6 }
   0xc   :  { %137 = vmatprep.subr.bf16.mxu0 %v240_v7 }
   0xf   :  { %138 = vmatpush1.bf16.msra.mxu0 %v242_v8 }
  0x10   :  { %139 = vmatprep.subr.bf16.mxu0 %v243_v9 }
  0x13   :  { %140 = vmatpush1.bf16.msra.mxu0 %v245_v10 }
  0x14   :  { %141 = vmatprep.subr.bf16.mxu0 %v246_v11 }
  0x17   :  { %142 = vmatpush1.bf16.msra.mxu0 %v248_v12 }
  0x18   :  { %143 = vmatprep.subr.bf16.mxu0 %v249_v13 }
  0x1b   :  { %144 = vmatpush1.bf16.msra.mxu0 %v251_v14 }
  0x1c   :  { %145 = vmatprep.subr.bf16.mxu0 %v252_v15 }
  0x1f   :  { %146 = vmatpush1.bf16.msra.mxu0 %v254_v16 }
  0x22   :  { %164 = vmatmul.mubr.bf16.vlgmr.msra.gmra.mxu0 %v255_v17 }
  0xe2   :  { %v165_v25 = vpop.f32.mrf.mxu0 }
  0xe3   :  { %v201_v26 = vadd.f32 %v194_v23, %v165_v25 }
  0xe4   :  { %v167_v27 = vpop.f32.mrf.mxu0 }
  0xe5   :  { %205 = vst [vmem:[%s346_s3] sm:$0xff] %v201_v26  ;;  %v202_v28 = vadd.f32 %v198_v24, %v167_v27 }
  0xe6   :  { %v169_v29 = vpop.f32.mrf.mxu0 }
  0xe7   :  { %206 = vst [vmem:[%s346_s3 + $0x8] sm:$0xff] %v202_v28  ;;  %v203_v30 = vadd.f32 %v194_v23, %v169_v29 }
  0xe8   :  { %v171_v31 = vpop.f32.mrf.mxu0 }
  0xe9   :  { %207 = vst [vmem:[%s346_s3 + $0x10] sm:$0xff] %v203_v30  ;;  %v204_v32 = vadd.f32 %v198_v24, %v171_v31 }
  0xeb   :  { %208 = vst [vmem:[%s346_s3 + $0x18] sm:$0xff] %v204_v32 }

// kernel: rnnt_forward.23
= control target key start
LH: loop header
LB: loop body
LE: loop exit
PB: predicated region body
PF: predicated region fallthrough
CT: control target
= control target key end

     0   :  { %s660_s9 = smov 0   ;;  %s782_s0 = inlined_call_operand.vmem [shape: f32[6,8,512], index: 0, kind: input, shape index: {}]   ;;  %s783_s1 = inlined_call_operand.vmem [shape: bf16[128,512], index: 1, kind: input, shape index: {}]   ;;  %s784_s2 = inlined_call_operand.vmem [shape: f32[6,8,128], index: 2, kind: output, shape index: {}]  }
   0x1 LB: > { %s514_s10 = sadd.s32 4294967295, %s641_s9   ;;  %p518_p0 = scmp.ge.s32.totalorder %s641_s9, 1  ;;  %s641_s9 = sphi %s660_s9, %s12_s9  }
   0x2   : > { %p112_p1 = scmp.lt.s32.totalorder %s641_s9, 7 }
   0x4   : > { %p113_p2 = pnand %p518_p0, %p112_p1 }
   0x5   : > { %p133_p3 = scmp.lt.s32.totalorder (!%p113_p2), %s514_s10, 5  ;;  %p522_p4 = scmp.ne.s32.totalorder (!%p113_p2), %s514_s10, 0 }
   0x6   : > { %116 = sbr.rel (%p113_p2) target bundleno = 303 (0x12f), region = 28 }
   0xb   : > { %s134_s11 = scalar_select %p133_p3, %s514_s10, 5 }
   0xc   : > { %146 = sbr.rel (%p522_p4) target bundleno = 19 (0x13), region = 32 }
   0xd   : > { %s560_s12 = sshll.u32 %s134_s11, 5  ;;  %s521_s13 = sshll.u32 %s134_s11, 3 }
   0xe   : > { %s671_s16 = scalar_lea.vmem %s782_s0, %s560_s12  ;;  %s676_s19 = scalar_lea.vmem %s784_s2, %s521_s13 }
  0x11   : > { %v643_v0 = vmov 0.0  }
  0x12   : > { %147 = vst [vmem:[#allocation2] sm:$0xff] %v643_v0  ;;  %148 = vst [vmem:[#allocation3] sm:$0xff] %v643_v0 }
  0x13 PF: > { %v571_v1 = vld [vmem:[%s783_s1 + $0xe4] ss:$16 sps:$4 sm:$0xff]   ;;  %v573_v2 = vld [vmem:[%s783_s1 + $0xe0] ss:$16 sps:$4 sm:$0xff]   ;;  %v644_v3 = vmov 0   ;;  %v152_v38 = vld [vmem:[%s671_s16 + $0x8] sm:$0xff] }
  0x14   : > { %380 = vmatprep.mubr.bf16.mxu0 %v644_v3  ;;  %421 = vmatprep.mubr.bf16.mxu1 %v644_v3  ;;  %v574_v4 = vld [vmem:[%s783_s1 + $0xc4] ss:$16 sps:$4 sm:$0xff]   ;;  %v576_v5 = vld [vmem:[%s783_s1 + $0xc0] ss:$16 sps:$4 sm:$0xff]   ;;  %v582_v7 = vld [vmem:[%s783_s1 + $0xec] ss:$16 sps:$4 sm:$0xff]  }
  0x15   : > { %348 = vmatprep.subr.bf16.mxu0 %v571_v1  ;;  %v577_v6 = vld [vmem:[%s783_s1 + $0xa4] ss:$16 sps:$4 sm:$0xff]   ;;  %v585_v8 = vld [vmem:[%s783_s1 + $0xe8] ss:$16 sps:$4 sm:$0xff]   ;;  %v579_v9 = vld [vmem:[%s783_s1 + $0xa0] ss:$16 sps:$4 sm:$0xff]   ;;  %389 = vmatprep.subr.bf16.mxu1 %v582_v7 }
  0x16   : > { %349 = vmatpush1.bf16.msra.mxu0 %v573_v2  ;;  %v580_v10 = vld [vmem:[%s783_s1 + $0x84] ss:$16 sps:$4 sm:$0xff]   ;;  %390 = vmatpush1.bf16.msra.mxu1 %v585_v8  ;;  %v588_v11 = vld [vmem:[%s783_s1 + $0xcc] ss:$16 sps:$4 sm:$0xff]   ;;  %v591_v12 = vld [vmem:[%s783_s1 + $0xc8] ss:$16 sps:$4 sm:$0xff]  }
  0x17   : > { %350 = vmatprep.subr.bf16.mxu0 %v574_v4  ;;  %391 = vmatprep.subr.bf16.mxu1 %v588_v11  ;;  %v584_v13 = vld [vmem:[%s783_s1 + $0x80] ss:$16 sps:$4 sm:$0xff]   ;;  %v586_v14 = vld [vmem:[%s783_s1 + $0x64] ss:$16 sps:$4 sm:$0xff]   ;;  %v594_v15 = vld [vmem:[%s783_s1 + $0xac] ss:$16 sps:$4 sm:$0xff]  }
  0x18   : > { %v597_v16 = vld [vmem:[%s783_s1 + $0xa8] ss:$16 sps:$4 sm:$0xff]   ;;  %v600_v17 = vld [vmem:[%s783_s1 + $0x8c] ss:$16 sps:$4 sm:$0xff]   ;;  %v590_v18 = vld [vmem:[%s783_s1 + $0x60] ss:$16 sps:$4 sm:$0xff]  }
  0x19   : > { %v592_v19 = vld [vmem:[%s783_s1 + $0x44] ss:$16 sps:$4 sm:$0xff]   ;;  %v603_v20 = vld [vmem:[%s783_s1 + $0x88] ss:$16 sps:$4 sm:$0xff]   ;;  %v606_v21 = vld [vmem:[%s783_s1 + $0x6c] ss:$16 sps:$4 sm:$0xff]  }
  0x1a   : > { %351 = vmatpush1.bf16.msra.mxu0 %v576_v5  ;;  %392 = vmatpush1.bf16.msra.mxu1 %v591_v12  ;;  %v596_v22 = vld [vmem:[%s783_s1 + $0x40] ss:$16 sps:$4 sm:$0xff]   ;;  %v598_v23 = vld [vmem:[%s783_s1 + $0x24] ss:$16 sps:$4 sm:$0xff]   ;;  %v609_v24 = vld [vmem:[%s783_s1 + $0x68] ss:$16 sps:$4 sm:$0xff]  }
  0x1b   : > { %352 = vmatprep.subr.bf16.mxu0 %v577_v6  ;;  %393 = vmatprep.subr.bf16.mxu1 %v594_v15  ;;  %v610_v25 = vld [vmem:[%s783_s1 + $0x4c] ss:$16 sps:$4 sm:$0xff]   ;;  %v602_v26 = vld [vmem:[%s783_s1 + $0x20] ss:$16 sps:$4 sm:$0xff]   ;;  %v604_v27 = vld [vmem:[%s783_s1 + $0x4] ss:$16 sps:$4 sm:$0xff]  }
  0x1c   : > { %v612_v28 = vld [vmem:[%s783_s1 + $0x48] ss:$16 sps:$4 sm:$0xff]   ;;  %v613_v29 = vld [vmem:[%s783_s1 + $0x2c] ss:$16 sps:$4 sm:$0xff]   ;;  %v608_v30 = vld [vmem:[%s783_s1] ss:$16 sps:$4 sm:$0xff]  }
  0x1d   : > { %v149_v31 = vld [vmem:[#allocation2] sm:$0xff]  ;;  %v615_v32 = vld [vmem:[%s783_s1 + $0x28] ss:$16 sps:$4 sm:$0xff]   ;;  %v616_v33 = vld [vmem:[%s783_s1 + $0xc] ss:$16 sps:$4 sm:$0xff]  }
  0x1e   : > { %353 = vmatpush1.bf16.msra.mxu0 %v579_v9  ;;  %394 = vmatpush1.bf16.msra.mxu1 %v597_v16  ;;  %v155_v34 = vpack.c.bf16 %v149_v31, %v149_v31  ;;  %v618_v35 = vld [vmem:[%s783_s1 + $0x8] ss:$16 sps:$4 sm:$0xff]   ;;  %v151_v36 = vld [vmem:[%s671_s16] sm:$0xff]  ;;  %v153_v51 = vld [vmem:[%s671_s16 + $0x10] sm:$0xff] }
  0x1f   : > { %354 = vmatprep.subr.bf16.mxu0 %v580_v10  ;;  %395 = vmatprep.subr.bf16.mxu1 %v600_v17  ;;  %v154_v48 = vld [vmem:[%s671_s16 + $0x18] sm:$0xff]  ;;  %v150_v62 = vld [vmem:[#allocation3] sm:$0xff] }
  0x22   : > { %355 = vmatpush1.bf16.msra.mxu0 %v584_v13  ;;  %396 = vmatpush1.bf16.msra.mxu1 %v603_v20 }
  0x23   : > { %356 = vmatprep.subr.bf16.mxu0 %v586_v14  ;;  %397 = vmatprep.subr.bf16.mxu1 %v606_v21 }
  0x26   : > { %357 = vmatpush1.bf16.msra.mxu0 %v590_v18  ;;  %398 = vmatpush1.bf16.msra.mxu1 %v609_v24 }
  0x27   : > { %358 = vmatprep.subr.bf16.mxu0 %v592_v19  ;;  %399 = vmatprep.subr.bf16.mxu1 %v610_v25 }
  0x2a   : > { %359 = vmatpush1.bf16.msra.mxu0 %v596_v22  ;;  %400 = vmatpush1.bf16.msra.mxu1 %v612_v28 }
  0x2b   : > { %360 = vmatprep.subr.bf16.mxu0 %v598_v23  ;;  %401 = vmatprep.subr.bf16.mxu1 %v613_v29 }
  0x2e   : > { %361 = vmatpush1.bf16.msra.mxu0 %v602_v26  ;;  %402 = vmatpush1.bf16.msra.mxu1 %v615_v32 }
  0x2f   : > { %362 = vmatprep.subr.bf16.mxu0 %v604_v27  ;;  %403 = vmatprep.subr.bf16.mxu1 %v616_v33 }
  0x32   : > { %363 = vmatpush1.bf16.msra.mxu0 %v608_v30  ;;  %404 = vmatpush1.bf16.msra.mxu1 %v618_v35 }
  0x35   : > { %381 = vmatmul.mubr.bf16.vlgmr.msra.gmra.mxu0 %v155_v34  ;;  %422 = vmatmul.mubr.bf16.vlgmr.msra.gmra.mxu1 %v155_v34 }
  0xf5   : > { %v382_v37 = vpop.f32.mrf.mxu0  ;;  %v423_v45 = vpop.f32.mrf.mxu1 }
  0xf6   : > { %v430_v39 = vadd.f32 %v382_v37, %v151_v36  ;;  %v432_v53 = vadd.f32 %v423_v45, %v153_v51 }
  0xf7   : > { %v384_v40 = vpop.f32.mrf.mxu0  ;;  %v425_v47 = vpop.f32.mrf.mxu1 }
  0xf8   : > { %v555_v41 = vmul.f32 -1.442695, %v430_v39  ;;  %v431_v42 = vadd.f32 %v384_v40, %v152_v38  ;;  %v433_v52 = vadd.f32 %v425_v47, %v154_v48 }
  0xf9   : > { %v386_v43 = vpop.f32.mrf.mxu0  ;;  %v427_v49 = vpop.f32.mrf.mxu1 }
  0xfa   : > { %619 = vpow2.f32 %v555_v41  ;;  %v556_v44 = vmul.f32 -1.442695, %v431_v42  ;;  %v557_v54 = vmul.f32 -1.442695, %v433_v52 }
  0xfb   : > { %v387_v46 = vpop.f32.mrf.mxu0  ;;  %v428_v50 = vpop.f32.mrf.mxu1 }
  0xfc   : > { %621 = vpow2.f32 %v556_v44 }
  0xfd   : > { %623 = vtanh.f32 %v432_v53 }
  0xfe   : > { %625 = vpow2.f32 %v557_v54 }
 0x107   : > { %v620_v55 = vpop.eup %619 }
 0x108   : > { %v437_v56 = vadd.f32 1.0, %v620_v55 }
 0x109   : > { %v622_v57 = vpop.eup %621 }
 0x10a   : > { %627 = vrcp.f32 %v437_v56  ;;  %v443_v58 = vadd.f32 1.0, %v622_v57  ;;  %v624_v59 = vpop.eup %623 }
 0x10b   : > { %v626_v60 = vpop.eup %625 }
 0x10c   : > { %629 = vrcp.f32 %v443_v58  ;;  %v450_v0 = vadd.f32 1.0, %v626_v60 }
 0x10e   : > { %631 = vrcp.f32 %v450_v0 }
 0x117   : > { %v628_v61 = vpop.eup %627 }
 0x118   : > { %v454_v2 = vmul.f32 %v628_v61, %v624_v59 }
 0x119   : > { %v630_v63 = vpop.eup %629 }
 0x11a   : > { %v453_v1 = vmul.f32 %v630_v63, %v150_v62 }
 0x11b   : > { %v632_v4 = vpop.eup %631 }
 0x11c   : > { %v455_v3 = vadd.f32 %v454_v2, %v453_v1 }
 0x11e   : > { %633 = vtanh.f32 %v455_v3  ;;  %459 = vst [vmem:[#allocation3] sm:$0xff] %v455_v3 }
 0x12b   : > { %v634_v5 = vpop.eup %633 }
 0x12c   : > { %v457_v6 = vmul.f32 %v634_v5, %v632_v4 }
 0x12e   : > { %458 = vst [vmem:[#allocation2] sm:$0xff] %v457_v6  ;;  %460 = vst [vmem:[%s676_s19] sm:$0xff] %v457_v6 }
 0x12f PF: > { %s12_s9 = sadd.s32 1, %s641_s9  }
 0x130   : > { %p9_p5 = scmp.ge.s32.totalorder %s12_s9, 8  }
 0x132   :  { %11 = sbr.rel (!%p9_p5) target bundleno = 1 (0x1), region = 62 }

// kernel: rnnt_forward.25
= control target key start
LH: loop header
LB: loop body
LE: loop exit
PB: predicated region body
PF: predicated region fallthrough
CT: control target
= control target key end

     0   :  { %s1007_s15 = smov 0   ;;  %s1009_s16 = smov 0   ;;  %s1118_s0 = inlined_call_operand.vmem [shape: bf16[2,8,256], index: 0, kind: input, shape index: {}]   ;;  %s1119_s1 = inlined_call_operand.vmem [shape: bf16[2,8,256], index: 1, kind: input, shape index: {}]   ;;  %s1120_s2 = inlined_call_operand.vmem [shape: bf16[256,128], index: 2, kind: input, shape index: {}]   ;;  %s1121_s3 = inlined_call_operand.vmem [shape: f32[1,128], index: 3, kind: input, shape index: {}]   ;;  %s1122_s4 = inlined_call_operand.vmem [shape: f32[2,8,8,128], index: 4, kind: output, shape index: {}]  }
   0x1   :  { %s1011_s17 = smov 0  }
   0x2 LB: > { %s33_s18 = sadd.s32 1, %s975_s16  ;;  %p799_p0 = scmp.ge.s32.totalorder %s979_s17, 1  ;;  %s979_s17 = sphi %s1011_s17, %s14_s17   ;;  %s975_s16 = sphi %s1009_s16, %s1124_s16   ;;  %s971_s15 = sphi %s1007_s15, %s1123_s15  }
   0x3   : > { %p35_p1 = scmp.ge.s32.totalorder %s33_s18, 2  ;;  %p207_p2 = scmp.lt.s32.totalorder %s979_s17, 3 }
   0x5   : > { %s1126_s18 = smov (%p35_p1, %s33_s18), 0  ;;  %p208_p3 = pnand %p799_p0, %p207_p2 }
   0x6   : > { %p253_p4 = scmp.lt.s32.totalorder (!%p208_p3), %s971_s15, 1 }
   0x7   : > { %211 = sbr.rel (%p208_p3) target bundleno = 264 (0x108), region = 36 }
   0xc   : > { %v909_v0 = vld [vmem:[%s1120_s2 + $0x78] sm:$0xff]   ;;  %v911_v2 = vld [vmem:[%s1120_s2 + $0x70] sm:$0xff]   ;;  %v913_v4 = vld [vmem:[%s1120_s2 + $0x68] sm:$0xff]   ;;  %s1128_s15 = smov (!%p253_p4, %s971_s15), 1  ;;  %v298_v9 = vlaneseq  ;;  %v981_v15 = vmov 1966171168  }
   0xd   : > { %v910_v1 = vld [vmem:[%s1120_s2 + $0x38] sm:$0xff]   ;;  %828 = vmatprep.subr.bf16.mxu0 %v909_v0  ;;  %868 = vmatprep.subr.bf16.mxu1 %v909_v0  ;;  %v912_v3 = vld [vmem:[%s1120_s2 + $0x30] sm:$0xff]   ;;  %v914_v5 = vld [vmem:[%s1120_s2 + $0x28] sm:$0xff]   ;;  %s825_s7 = sshll.u32 %s1128_s15, 3  ;;  %v296_v16 = vunpack.c.l.s4 %v981_v15  ;;  %s827_s10 = sshll.u32 %s1128_s15, 6 }
   0xe   : > { %829 = vmatpush3.bf16.msra.mxu0 %v910_v1  ;;  %876 = vmatpush3.bf16.msra.mxu1 %v910_v1  ;;  %v915_v6 = vld [vmem:[%s1120_s2 + $0x60] sm:$0xff]   ;;  %v917_v8 = vld [vmem:[%s1120_s2 + $0x58] sm:$0xff]   ;;  %s261_s14 = scalar_lea.vmem %s1118_s0, %s825_s7  ;;  %v919_v11 = vld [vmem:[%s1120_s2 + $0x50] sm:$0xff]   ;;  %v299_v17 = vshrl.u32 %v298_v9, 7  ;;  %s270_s27 = scalar_lea.vmem %s1119_s1, %s825_s7 }
   0xf   : > { %830 = vmatprep.subr.bf16.mxu0 %v911_v2  ;;  %869 = vmatprep.subr.bf16.mxu1 %v911_v2  ;;  %v916_v7 = vld [vmem:[%s1120_s2 + $0x20] sm:$0xff]   ;;  %v918_v10 = vld [vmem:[%s1120_s2 + $0x18] sm:$0xff]   ;;  %v920_v18 = vld [vmem:[%s1120_s2 + $0x10] sm:$0xff]   ;;  %v297_v21 = vunpack.c.0.s8 %v296_v16  ;;  %s1099_s19 = scalar_lea.vmem %s1122_s4, %s827_s10 }
  0x10   : > { %v285_v12 = vld [vmem:[%s261_s14] sm:$0xff]  ;;  %v921_v19 = vld [vmem:[%s1120_s2 + $0x48] sm:$0xff]   ;;  %v349_v28 = vsub.s32 1, %v299_v17  ;;  %v1079_v31 = vsub.s32 0, %v299_v17 }
  0x11   : > { %v286_v13 = vunpack.c.l.bf16 %v285_v12  ;;  %v287_v14 = vunpack.c.h.bf16 %v285_v12  ;;  %v288_v23 = vld [vmem:[%s270_s27] sm:$0xff]  ;;  %v300_v24 = vsub.s32 %v297_v21, %v299_v17  ;;  %v922_v25 = vld [vmem:[%s1120_s2 + $0x8] sm:$0xff]  }
  0x12   : > { %831 = vmatpush3.bf16.msra.mxu0 %v912_v3  ;;  %877 = vmatpush3.bf16.msra.mxu1 %v912_v3  ;;  %v923_v26 = vld [vmem:[%s1120_s2 + $0x40] sm:$0xff]   ;;  %v290_v30 = vunpack.c.h.bf16 %v288_v23  ;;  %v289_v37 = vunpack.c.l.bf16 %v288_v23 }
  0x13   : > { %832 = vmatprep.subr.bf16.mxu0 %v913_v4  ;;  %870 = vmatprep.subr.bf16.mxu1 %v913_v4  ;;  %v293_v20 = vcombine.low %v286_v13, %v287_v14  ;;  %v294_v22 = vcombine.high %v286_v13, %v287_v14  ;;  %v924_v36 = vld [vmem:[%s1120_s2] sm:$0xff]  }
  0x15   : > { %v301_v27 = vrot.slane %v293_v20, %v300_v24  ;;  %v308_v29 = vrot.slane %v294_v22, %v300_v24 }
  0x16   : > { %833 = vmatpush3.bf16.msra.mxu0 %v914_v5  ;;  %878 = vmatpush3.bf16.msra.mxu1 %v914_v5 }
  0x17   : > { %834 = vmatprep.subr.bf16.mxu0 %v915_v6  ;;  %871 = vmatprep.subr.bf16.mxu1 %v915_v6  ;;  %v309_v32 = vcombine.high %v301_v27, %v301_v27  ;;  %v317_v33 = vrot.slane %v301_v27, %v300_v24  ;;  %v310_v34 = vcombine.high %v308_v29, %v308_v29 }
  0x18   : > { %v324_v35 = vrot.slane %v308_v29, %v300_v24 }
  0x19   : > { %v331_v38 = vrot.slane %v309_v32, %v300_v24  ;;  %v350_v39 = vrot.slane %v317_v33, %v349_v28  ;;  %v338_v40 = vrot.slane %v310_v34, %v300_v24  ;;  %v346_v42 = vrot.slane %v317_v33, %v1079_v31 }
  0x1a   : > { %835 = vmatpush3.bf16.msra.mxu0 %v916_v7  ;;  %879 = vmatpush3.bf16.msra.mxu1 %v916_v7  ;;  %v382_v41 = vrot.slane %v324_v35, %v349_v28  ;;  %v378_v43 = vrot.slane %v324_v35, %v1079_v31  ;;  %v339_v44 = vcombine.high %v317_v33, %v317_v33 }
  0x1b   : > { %836 = vmatprep.subr.bf16.mxu0 %v917_v8  ;;  %872 = vmatprep.subr.bf16.mxu1 %v917_v8  ;;  %v358_v45 = vrot.slane %v331_v38, %v349_v28  ;;  %v424_v46 = vadd.f32 %v350_v39, %v290_v30  ;;  %v390_v47 = vrot.slane %v338_v40, %v349_v28 }
  0x1c   : > { %v354_v48 = vrot.slane %v331_v38, %v1079_v31  ;;  %v432_v49 = vadd.f32 %v382_v41, %v290_v30  ;;  %v386_v50 = vrot.slane %v338_v40, %v1079_v31  ;;  %v423_v53 = vadd.f32 %v346_v42, %v289_v37 }
  0x1d   : > { %v426_v51 = vadd.f32 %v358_v45, %v290_v30  ;;  %925 = vtanh.f32 %v424_v46  ;;  %v434_v52 = vadd.f32 %v390_v47, %v290_v30  ;;  %v431_v55 = vadd.f32 %v378_v43, %v289_v37 }
  0x1e   : > { %837 = vmatpush3.bf16.msra.mxu0 %v918_v10  ;;  %880 = vmatpush3.bf16.msra.mxu1 %v918_v10  ;;  %927 = vtanh.f32 %v432_v49  ;;  %v425_v54 = vadd.f32 %v354_v48, %v289_v37  ;;  %v341_v56 = vcombine.high %v331_v38, %v331_v38  ;;  %v366_v57 = vrot.slane %v339_v44, %v349_v28  ;;  %v806_v38 = vld [vmem:[%s1121_s3] ss:$0 sm:$0xff] }
  0x1f   : > { %838 = vmatprep.subr.bf16.mxu0 %v919_v11  ;;  %873 = vmatprep.subr.bf16.mxu1 %v919_v11  ;;  %929 = vtanh.f32 %v426_v51  ;;  %v340_v58 = vcombine.high %v324_v35, %v324_v35  ;;  %v342_v59 = vcombine.high %v338_v40, %v338_v40  ;;  %v433_v60 = vadd.f32 %v386_v50, %v289_v37 }
  0x20   : > { %931 = vtanh.f32 %v434_v52  ;;  %v374_v61 = vrot.slane %v341_v56, %v349_v28  ;;  %v362_v62 = vrot.slane %v339_v44, %v1079_v31  ;;  %v428_v63 = vadd.f32 %v366_v57, %v290_v30 }
  0x21   : > { %933 = vtanh.f32 %v423_v53  ;;  %v398_v0 = vrot.slane %v340_v58, %v349_v28  ;;  %v406_v1 = vrot.slane %v342_v59, %v349_v28  ;;  %v370_v3 = vrot.slane %v341_v56, %v1079_v31 }
  0x22   : > { %839 = vmatpush3.bf16.msra.mxu0 %v920_v18  ;;  %881 = vmatpush3.bf16.msra.mxu1 %v920_v18  ;;  %935 = vtanh.f32 %v425_v54  ;;  %v430_v2 = vadd.f32 %v374_v61, %v290_v30  ;;  %v394_v5 = vrot.slane %v340_v58, %v1079_v31  ;;  %v402_v7 = vrot.slane %v342_v59, %v1079_v31 }
  0x23   : > { %840 = vmatprep.subr.bf16.mxu0 %v921_v19  ;;  %874 = vmatprep.subr.bf16.mxu1 %v921_v19  ;;  %937 = vtanh.f32 %v431_v55  ;;  %v436_v4 = vadd.f32 %v398_v0, %v290_v30  ;;  %v438_v6 = vadd.f32 %v406_v1, %v290_v30  ;;  %v427_v8 = vadd.f32 %v362_v62, %v289_v37 }
  0x24   : > { %939 = vtanh.f32 %v433_v60  ;;  %v429_v9 = vadd.f32 %v370_v3, %v289_v37  ;;  %v435_v10 = vadd.f32 %v394_v5, %v289_v37  ;;  %v437_v11 = vadd.f32 %v402_v7, %v289_v37 }
  0x25   : > { %941 = vtanh.f32 %v428_v63 }
  0x26   : > { %841 = vmatpush3.bf16.msra.mxu0 %v922_v25  ;;  %882 = vmatpush3.bf16.msra.mxu1 %v922_v25  ;;  %943 = vtanh.f32 %v430_v2 }
  0x27   : > { %842 = vmatprep.subr.bf16.mxu0 %v923_v26  ;;  %875 = vmatprep.subr.bf16.mxu1 %v923_v26  ;;  %945 = vtanh.f32 %v436_v4 }
  0x28   : > { %947 = vtanh.f32 %v438_v6 }
  0x29   : > { %949 = vtanh.f32 %v427_v8 }
  0x2a   : > { %843 = vmatpush3.bf16.msra.mxu0 %v924_v36  ;;  %883 = vmatpush3.bf16.msra.mxu1 %v924_v36  ;;  %v926_v12 = vpop.eup %925  ;;  %951 = vtanh.f32 %v429_v9 }
  0x2b   : > { %v928_v13 = vpop.eup %927  ;;  %953 = vtanh.f32 %v435_v10 }
  0x2c   : > { %v930_v14 = vpop.eup %929  ;;  %955 = vtanh.f32 %v437_v11 }
  0x2d   : > { %v932_v15 = vpop.eup %931  ;;  %v456_v16 = vpack.c.bf16 %v930_v14, %v926_v12 }
  0x2e   : > { %v934_v17 = vpop.eup %933  ;;  %v460_v18 = vpack.c.bf16 %v932_v15, %v928_v13 }
  0x2f   : > { %v936_v19 = vpop.eup %935  ;;  %630 = vmatprep.mubr.bf16.mxu0 %v456_v16 }
  0x30   : > { %v938_v20 = vpop.eup %937  ;;  %646 = vmatprep.mubr.bf16.mxu1 %v460_v18  ;;  %v455_v21 = vpack.c.bf16 %v936_v19, %v934_v17 }
  0x31   : > { %v940_v22 = vpop.eup %939 }
  0x32   : > { %v942_v23 = vpop.eup %941  ;;  %631 = vmatmul.mubr.bf16.vlgmr.msra.gmra.mxu0 %v455_v21  ;;  %v459_v24 = vpack.c.bf16 %v940_v22, %v938_v20 }
  0x33   : > { %v944_v25 = vpop.eup %943 }
  0x34   : > { %v946_v26 = vpop.eup %945  ;;  %647 = vmatmul.mubr.bf16.vlgmr.msra.gmra.mxu1 %v459_v24  ;;  %v458_v27 = vpack.c.bf16 %v944_v25, %v942_v23 }
  0x35   : > { %v948_v28 = vpop.eup %947 }
  0x36   : > { %v950_v29 = vpop.eup %949  ;;  %638 = vmatprep.mubr.bf16.mxu0 %v458_v27  ;;  %v462_v30 = vpack.c.bf16 %v948_v28, %v946_v26 }
  0x37   : > { %v952_v31 = vpop.eup %951 }
  0x38   : > { %v954_v32 = vpop.eup %953  ;;  %654 = vmatprep.mubr.bf16.mxu1 %v462_v30  ;;  %v457_v33 = vpack.c.bf16 %v952_v31, %v950_v29 }
  0x39   : > { %v956_v34 = vpop.eup %955 }
  0x3a   : > { %639 = vmatmul.mubr.bf16.gmra.mxu0 %v457_v33  ;;  %v461_v35 = vpack.c.bf16 %v956_v34, %v954_v32 }
  0x3c   : > { %655 = vmatmul.mubr.bf16.gmra.mxu1 %v461_v35 }
  0xf2   : > { %v844_v36 = vpop.f32.mrf.mxu0 }
  0xf4   : > { %v856_v37 = vpop.f32.mrf.mxu1  ;;  %v845_v39 = vpop.f32.mrf.mxu0 }
  0xf5   : > { %v846_v40 = vadd.f32 %v845_v39, %v844_v36 }
  0xf6   : > { %v857_v41 = vpop.f32.mrf.mxu1  ;;  %v847_v42 = vpop.f32.mrf.mxu0 }
  0xf7   : > { %v633_v43 = vadd.f32 %v846_v40, %v806_v38  ;;  %v858_v44 = vadd.f32 %v857_v41, %v856_v37 }
  0xf8   : > { %v859_v45 = vpop.f32.mrf.mxu1  ;;  %v848_v46 = vpop.f32.mrf.mxu0 }
  0xf9   : > { %663 = vst [vmem:[%s1099_s19] sm:$0xff] %v633_v43  ;;  %v649_v47 = vadd.f32 %v858_v44, %v806_v38  ;;  %v849_v48 = vadd.f32 %v848_v46, %v847_v42 }
  0xfa   : > { %v860_v49 = vpop.f32.mrf.mxu1  ;;  %v850_v50 = vpop.f32.mrf.mxu0 }
  0xfb   : > { %667 = vst [vmem:[%s1099_s19 + $0x20] sm:$0xff] %v649_v47  ;;  %v636_v51 = vadd.f32 %v849_v48, %v806_v38  ;;  %v861_v52 = vadd.f32 %v860_v49, %v859_v45 }
  0xfc   : > { %v862_v53 = vpop.f32.mrf.mxu1  ;;  %v851_v54 = vpop.f32.mrf.mxu0 }
  0xfd   : > { %664 = vst [vmem:[%s1099_s19 + $0x8] sm:$0xff] %v636_v51  ;;  %v652_v55 = vadd.f32 %v861_v52, %v806_v38  ;;  %v852_v56 = vadd.f32 %v851_v54, %v850_v50 }
  0xfe   : > { %v863_v57 = vpop.f32.mrf.mxu1  ;;  %v853_v58 = vpop.f32.mrf.mxu0 }
  0xff   : > { %668 = vst [vmem:[%s1099_s19 + $0x28] sm:$0xff] %v652_v55  ;;  %v641_v59 = vadd.f32 %v852_v56, %v806_v38  ;;  %v864_v60 = vadd.f32 %v863_v57, %v862_v53 }
 0x100   : > { %v865_v61 = vpop.f32.mrf.mxu1  ;;  %v854_v62 = vpop.f32.mrf.mxu0 }
 0x101   : > { %665 = vst [vmem:[%s1099_s19 + $0x10] sm:$0xff] %v641_v59  ;;  %v657_v63 = vadd.f32 %v864_v60, %v806_v38  ;;  %v855_v0 = vadd.f32 %v854_v62, %v853_v58 }
 0x102   : > { %v866_v1 = vpop.f32.mrf.mxu1 }
 0x103   : > { %669 = vst [vmem:[%s1099_s19 + $0x30] sm:$0xff] %v657_v63  ;;  %v644_v2 = vadd.f32 %v855_v0, %v806_v38  ;;  %v867_v3 = vadd.f32 %v866_v1, %v865_v61 }
 0x105   : > { %666 = vst [vmem:[%s1099_s19 + $0x18] sm:$0xff] %v644_v2  ;;  %v660_v4 = vadd.f32 %v867_v3, %v806_v38 }
 0x107   : > { %670 = vst [vmem:[%s1099_s19 + $0x38] sm:$0xff] %v660_v4 }
 0x108 PF: > { %s14_s17 = sadd.s32 1, %s979_s17   ;;  %s1123_s15 = smov %s975_s16 }
 0x109   : > { %p11_p5 = scmp.ge.s32.totalorder %s14_s17, 4   ;;  %s1124_s16 = smov %s1126_s18 }
 0x10b   :  { %13 = sbr.rel (!%p11_p5) target bundleno = 2 (0x2), region = 69 }

</bundles_post_ra>
